<compile_context>
chip_gen: v7x
topology: tpu7x:2x2x1
jax: 0.10.0
libtpu: 0.0.40
codegen_flags: <defaults>
</compile_context>

<pallas_src>
import functools
import math

import jax
import jax.numpy as jnp
from jax.experimental import pallas as pl
from jax.experimental.pallas import tpu as pltpu

_VMEM_LIMIT = 32 * 1024 * 1024   # safe on v5e (16 MiB default scoped) and v7x (64 MiB phys)
_NEG_INF = -1e30


def _pick_tile(full, desired, align):
    """Largest tile <= desired that is a multiple of `align` and divides `full`.
    Falls back to `full` (un-tiled axis) when no aligned divisor exists."""
    if full <= desired:
        return full
    t = (desired // align) * align
    while t >= align:
        if full % t == 0:
            return t
        t -= align
    return full


def _layernorm(x, g, b, eps):
    mu = jnp.mean(x, axis=-1, keepdims=True)
    var = jnp.mean(jnp.square(x - mu), axis=-1, keepdims=True)
    return (x - mu) * jax.lax.rsqrt(var + eps) * g + b


def _gelu(x):
    # gelu used by pytorch_pretrained_bert GPT2 (tanh approximation)
    return 0.5 * x * (1.0 + jnp.tanh(
        math.sqrt(2.0 / math.pi) * (x + 0.044715 * x ** 3)))


# --------------------------------------------------------------------------------------
# Kernels
# --------------------------------------------------------------------------------------

def ln_matmul_kernel(x_ref, g_ref, b_ref, w_ref, bias_ref, o_ref, *, eps, apply_gelu):
    # fused LayerNorm + projection (+ optional GELU); bf16 MXU inputs, f32 accumulation
    h = _layernorm(x_ref[...], g_ref[...], b_ref[...], eps)          # (tn, D) f32
    y = jnp.dot(h.astype(jnp.bfloat16), w_ref[...],                  # w_ref is bf16
                preferred_element_type=jnp.float32) + bias_ref[...]
    if apply_gelu:
        y = _gelu(y)
    o_ref[...] = y


def residual_matmul_kernel(res_ref, y_ref, w_ref, bias_ref, o_ref):
    # out = res + y @ W + bias, accumulated directly in the revisited f32 output block
    k = pl.program_id(2)

    @pl.when(k == 0)
    def _init():
        o_ref[...] = res_ref[...] + bias_ref[...]

    o_ref[...] += jnp.dot(y_ref[...].astype(jnp.bfloat16), w_ref[...],
                          preferred_element_type=jnp.float32)


def flash_attn_kernel(q_ref, k_ref, v_ref, o_ref, m_sc, l_sc, acc_sc, *,
                      scale, tile_q, tile_k):
    qi = pl.program_id(1)
    ki = pl.program_id(2)

    @pl.when(ki == 0)
    def _init():
        m_sc[...] = jnp.full(m_sc.shape, _NEG_INF, m_sc.dtype)
        l_sc[...] = jnp.zeros(l_sc.shape, l_sc.dtype)
        acc_sc[...] = jnp.zeros(acc_sc.shape, acc_sc.dtype)

    # KV tiles strictly above the diagonal are fully masked: skip their compute.
    # (Their DMA is also avoided via the clamped index_map in the BlockSpec.)
    @pl.when(ki <= qi)
    def _update():
        q = (q_ref[0] * scale).astype(jnp.bfloat16)                  # (tq, hd)
        kk = k_ref[0].astype(jnp.bfloat16)                           # (tk, hd)
        s = jax.lax.dot_general(q, kk, (((1,), (1,)), ((), ())),
                                preferred_element_type=jnp.float32)  # (tq, tk)
        q_pos = qi * tile_q + jax.lax.broadcasted_iota(jnp.int32, (tile_q, tile_k), 0)
        k_pos = ki * tile_k + jax.lax.broadcasted_iota(jnp.int32, (tile_q, tile_k), 1)
        s = jnp.where(k_pos <= q_pos, s, _NEG_INF)
        m_prev = m_sc[...]
        m_new = jnp.maximum(m_prev, jnp.max(s, axis=-1, keepdims=True))
        alpha = jnp.exp(m_prev - m_new)
        p = jnp.exp(s - m_new)
        l_sc[...] = alpha * l_sc[...] + jnp.sum(p, axis=-1, keepdims=True)
        acc_sc[...] = alpha * acc_sc[...] + jnp.dot(
            p.astype(jnp.bfloat16), v_ref[0].astype(jnp.bfloat16),
            preferred_element_type=jnp.float32)
        m_sc[...] = m_new

    # The diagonal tile is the last contributing KV tile for this q tile.
    @pl.when(ki == qi)
    def _finalize():
        inv_l = pl.reciprocal(l_sc[...], approx=True)
        o_ref[0] = (acc_sc[...] * inv_l).astype(o_ref.dtype)


def lm_head_kernel(h_ref, g_ref, b_ref, wte_ref, o_ref, *, eps):
    # final LayerNorm (ln_f) + tied LM head: logits_tile = ln_f(h_tile) @ wte_tile^T
    h = _layernorm(h_ref[...], g_ref[...], b_ref[...], eps).astype(jnp.bfloat16)
    o_ref[...] = jax.lax.dot_general(h, wte_ref[...], (((1,), (1,)), ((), ())),
                                     preferred_element_type=jnp.float32)


# --------------------------------------------------------------------------------------
# Pallas-call wrappers (grid / BlockSpec plumbing)
# --------------------------------------------------------------------------------------

def ln_matmul(x, g, b, w, bias, *, eps, apply_gelu, row_tile=256, col_tile=512):
    N, D = x.shape
    F = w.shape[1]
    tn = _pick_tile(N, row_tile, 8)
    tf = _pick_tile(F, col_tile, 128)
    kernel = functools.partial(ln_matmul_kernel, eps=eps, apply_gelu=apply_gelu)
    return pl.pallas_call(
        kernel,
        out_shape=jax.ShapeDtypeStruct((N, F), jnp.float32),
        grid=(N // tn, F // tf),
        in_specs=[
            pl.BlockSpec((tn, D), lambda i, j: (i, 0)),
            pl.BlockSpec((1, D), lambda i, j: (0, 0)),
            pl.BlockSpec((1, D), lambda i, j: (0, 0)),
            pl.BlockSpec((D, tf), lambda i, j: (0, j)),
            pl.BlockSpec((1, tf), lambda i, j: (0, j)),
        ],
        out_specs=pl.BlockSpec((tn, tf), lambda i, j: (i, j)),
        compiler_params=pltpu.CompilerParams(
            dimension_semantics=("parallel", "parallel"),
            vmem_limit_bytes=_VMEM_LIMIT),
    )(x, g, b, w, bias)


def residual_matmul(res, y, w, bias, *, row_tile=256, col_tile=256, k_tile=512):
    N, D = res.shape
    K = y.shape[1]
    tn = _pick_tile(N, row_tile, 8)
    td = _pick_tile(D, col_tile, 128)
    tk = _pick_tile(K, k_tile, 128)
    return pl.pallas_call(
        residual_matmul_kernel,
        out_shape=jax.ShapeDtypeStruct((N, D), jnp.float32),
        grid=(N // tn, D // td, K // tk),
        in_specs=[
            pl.BlockSpec((tn, td), lambda i, j, k: (i, j)),
            pl.BlockSpec((tn, tk), lambda i, j, k: (i, k)),
            pl.BlockSpec((tk, td), lambda i, j, k: (k, j)),
            pl.BlockSpec((1, td), lambda i, j, k: (0, j)),
        ],
        out_specs=pl.BlockSpec((tn, td), lambda i, j, k: (i, j)),
        input_output_aliases={0: 0},   # residual-updated activations reuse the input HBM buffer
        compiler_params=pltpu.CompilerParams(
            dimension_semantics=("parallel", "parallel", "arbitrary"),
            vmem_limit_bytes=_VMEM_LIMIT),
    )(res, y, w, bias)


def flash_attention(q, k, v, *, scale, seq_tile=128):
    BH, T, hd = q.shape
    tile = _pick_tile(T, seq_tile, 8)
    nt = T // tile
    kernel = functools.partial(flash_attn_kernel, scale=scale, tile_q=tile, tile_k=tile)
    return pl.pallas_call(
        kernel,
        out_shape=jax.ShapeDtypeStruct((BH, T, hd), jnp.float32),
        grid=(BH, nt, nt),
        in_specs=[
            pl.BlockSpec((1, tile, hd), lambda b, qi, ki: (b, qi, 0)),
            # clamp the kv block index so fully-masked (skipped) tiles are not re-DMA'd
            pl.BlockSpec((1, tile, hd), lambda b, qi, ki: (b, jnp.minimum(ki, qi), 0)),
            pl.BlockSpec((1, tile, hd), lambda b, qi, ki: (b, jnp.minimum(ki, qi), 0)),
        ],
        out_specs=pl.BlockSpec((1, tile, hd), lambda b, qi, ki: (b, qi, 0)),
        scratch_shapes=[
            pltpu.VMEM((tile, 1), jnp.float32),    # running max m
            pltpu.VMEM((tile, 1), jnp.float32),    # running denom l
            pltpu.VMEM((tile, hd), jnp.float32),   # running accumulator
        ],
        compiler_params=pltpu.CompilerParams(
            dimension_semantics=("parallel", "parallel", "arbitrary"),
            vmem_limit_bytes=_VMEM_LIMIT),
    )(q, k, v)


def lm_head(h, g, b, wte, *, eps, row_tile=256, vocab_tile=512):
    N, D = h.shape
    V = wte.shape[0]
    Vp = ((V + 127) // 128) * 128                 # lane-dense logits tiles
    wte_p = jnp.pad(wte, ((0, Vp - V), (0, 0))) if Vp != V else wte
    tn = _pick_tile(N, row_tile, 8)
    tv = _pick_tile(Vp, vocab_tile, 128)
    kernel = functools.partial(lm_head_kernel, eps=eps)
    logits = pl.pallas_call(
        kernel,
        out_shape=jax.ShapeDtypeStruct((N, Vp), jnp.float32),
        grid=(N // tn, Vp // tv),
        in_specs=[
            pl.BlockSpec((tn, D), lambda i, j: (i, 0)),
            pl.BlockSpec((1, D), lambda i, j: (0, 0)),
            pl.BlockSpec((1, D), lambda i, j: (0, 0)),
            pl.BlockSpec((tv, D), lambda i, j: (j, 0)),
        ],
        out_specs=pl.BlockSpec((tn, tv), lambda i, j: (i, j)),
        compiler_params=pltpu.CompilerParams(
            dimension_semantics=("parallel", "parallel"),
            vmem_limit_bytes=_VMEM_LIMIT),
    )(h, g, b, wte_p)
    return logits[:, :V]


# --------------------------------------------------------------------------------------
# Model glue (embeddings, parameters, forward pass, loss)
# --------------------------------------------------------------------------------------

def sinusoidal_pos_emb(position_ids, d):
    # PositionalEmbedding(n_embd): Transformer-XL style cat([sin, cos], -1)
    inv_freq = 1.0 / (10000.0 ** (jnp.arange(0, d, 2, dtype=jnp.float32) / d))
    ang = position_ids[..., None].astype(jnp.float32) * inv_freq     # (B, T, d/2)
    return jnp.concatenate([jnp.sin(ang), jnp.cos(ang)], axis=-1)


def init_params(key, vocab_size, n_embd, n_layers, init_range):
    D = n_embd
    keys = jax.random.split(key, 1 + 4 * n_layers)
    # matmul weights stored bf16 in HBM (halves weight DMA); biases / LN params f32
    wte = (init_range * jax.random.normal(keys[0], (vocab_size, D), jnp.float32)
           ).astype(jnp.bfloat16)
    blocks = []
    for l in range(n_layers):
        k0, k1, k2, k3 = keys[1 + 4 * l: 1 + 4 * (l + 1)]
        blocks.append((
            jnp.ones((1, D), jnp.float32),                                        # ln_1.g
            jnp.zeros((1, D), jnp.float32),                                       # ln_1.b
            (init_range * jax.random.normal(k0, (D, 3 * D), jnp.float32)
             ).astype(jnp.bfloat16),                                              # c_attn.w
            jnp.zeros((1, 3 * D), jnp.float32),                                   # c_attn.b
            (init_range * jax.random.normal(k1, (D, D), jnp.float32)
             ).astype(jnp.bfloat16),                                              # attn c_proj.w
            jnp.zeros((1, D), jnp.float32),                                       # attn c_proj.b
            jnp.ones((1, D), jnp.float32),                                        # ln_2.g
            jnp.zeros((1, D), jnp.float32),                                       # ln_2.b
            (init_range * jax.random.normal(k2, (D, 4 * D), jnp.float32)
             ).astype(jnp.bfloat16),                                              # mlp c_fc.w
            jnp.zeros((1, 4 * D), jnp.float32),                                   # mlp c_fc.b
            (init_range * jax.random.normal(k3, (4 * D, D), jnp.float32)
             ).astype(jnp.bfloat16),                                              # mlp c_proj.w
            jnp.zeros((1, D), jnp.float32),                                       # mlp c_proj.b
        ))
    lnf_g = jnp.ones((1, D), jnp.float32)
    lnf_b = jnp.zeros((1, D), jnp.float32)
    return wte, blocks, lnf_g, lnf_b


def gpt2_forward(src, tgt, params, *, n_head, eps, padding=0):
    wte, blocks, lnf_g, lnf_b = params
    B, T = src.shape
    D = wte.shape[1]
    hd = D // n_head
    scale = 1.0 / math.sqrt(hd)

    # embedding gather + Transformer-XL sinusoidal positions (plain-JAX glue)
    tok = jnp.take(wte, src, axis=0).astype(jnp.float32)              # (B, T, D)
    pos_ids = jnp.broadcast_to(jnp.arange(T, dtype=jnp.int32)[None, :], (B, T))
    x = (tok + sinusoidal_pos_emb(pos_ids, D)).reshape(B * T, D)      # (N, D)

    # TODO(synk): overlap next-layer weight DMA with current-layer compute
    # (stacked-layer grid axis or cross-pallas_call DMA futures).
    for blk in blocks:
        (ln1_g, ln1_b, w_qkv, b_qkv, w_ao, b_ao,
         ln2_g, ln2_b, w_fc, b_fc, w_mo, b_mo) = blk

        # ---- attention sub-block: x = x + attn(ln_1(x)) ----
        qkv = ln_matmul(x, ln1_g, ln1_b, w_qkv, b_qkv, eps=eps, apply_gelu=False)
        qkv = qkv.reshape(B, T, 3, n_head, hd).transpose(2, 0, 3, 1, 4)   # (3,B,H,T,hd)
        q = qkv[0].reshape(B * n_head, T, hd)
        k = qkv[1].reshape(B * n_head, T, hd)
        v = qkv[2].reshape(B * n_head, T, hd)
        ctx = flash_attention(q, k, v, scale=scale)                       # (B*H, T, hd)
        ctx = ctx.reshape(B, n_head, T, hd).transpose(0, 2, 1, 3).reshape(B * T, D)
        x = residual_matmul(x, ctx, w_ao, b_ao)

        # ---- MLP sub-block: x = x + mlp(ln_2(x)) ----
        u = ln_matmul(x, ln2_g, ln2_b, w_fc, b_fc, eps=eps, apply_gelu=True)
        x = residual_matmul(x, u, w_mo, b_mo)

    logits = lm_head(x, lnf_g, lnf_b, wte, eps=eps).reshape(B, T, -1)
    output = {'logits': logits}
    if tgt is not None:
        # CrossEntropyLoss(ignore_index=padding) over flattened logits (glue)
        lse = jax.nn.logsumexp(logits, axis=-1)
        picked = jnp.take_along_axis(logits, tgt[..., None], axis=-1)[..., 0]
        nll = lse - picked
        mask = (tgt != padding).astype(jnp.float32)
        output['loss'] = jnp.sum(nll * mask) / jnp.maximum(jnp.sum(mask), 1.0)
    return output


if __name__ == "__main__":
    # small, forward-consistent shapes
    vocab_size = 128
    n_embd = 32
    n_layers = 2
    n_head = 4
    layer_norm_epsilon = 1e-5
    initializer_range = 0.02
    padding = 0
    B, T = 2, 8

    root = jax.random.PRNGKey(0)
    k_param, k_src, k_tgt = jax.random.split(root, 3)
    params = init_params(k_param, vocab_size, n_embd, n_layers, initializer_range)

    src = jax.random.randint(k_src, (B, T), 0, vocab_size, dtype=jnp.int32)
    tgt = jax.random.randint(k_tgt, (B, T), 0, vocab_size, dtype=jnp.int32)

    fwd = jax.jit(functools.partial(gpt2_forward, n_head=n_head,
                                    eps=layer_norm_epsilon, padding=padding))
    out = fwd(src, tgt, params)
    jax.block_until_ready(out['logits'])
    jax.block_until_ready(out['loss'])
    assert out['logits'].shape == (B, T, vocab_size)
    assert bool(jnp.isfinite(out['loss']))
    print("KERNEL_OK")
</pallas_src>

<mosaic_0001>
module attributes {stable_mosaic.version = 11 : i64} {
  func.func @ln_matmul_kernel(%arg0: i32, %arg1: i32, %arg2: memref<16x32xf32, #tpu.memory_space<vmem>>, %arg3: memref<1x32xf32, #tpu.memory_space<vmem>>, %arg4: memref<1x32xf32, #tpu.memory_space<vmem>>, %arg5: memref<32x96xbf16, #tpu.memory_space<vmem>>, %arg6: memref<1x96xf32, #tpu.memory_space<vmem>>, %arg7: memref<16x96xf32, #tpu.memory_space<vmem>>) attributes {dimension_semantics = [#tpu.dimension_semantics<parallel>, #tpu.dimension_semantics<parallel>], iteration_bounds = array<i64: 1, 1>, scalar_prefetch = 0 : i64, scratch_operands = 0 : i64, tpu.core_type = #tpu.core_type<tc>, window_params = [{transform_indices = @transform_0, window_bounds = array<i64: 16, 32>}, {pipeline_mode = #tpu.pipeline_mode<synchronous>, transform_indices = @transform_1, window_bounds = array<i64: 1, 32>}, {pipeline_mode = #tpu.pipeline_mode<synchronous>, transform_indices = @transform_2, window_bounds = array<i64: 1, 32>}, {transform_indices = @transform_3, window_bounds = array<i64: 32, 96>}, {transform_indices = @transform_4, window_bounds = array<i64: 1, 96>}, {transform_indices = @transform_5, window_bounds = array<i64: 16, 96>}]} {
    %c0 = arith.constant 0 : index
    %c0_0 = arith.constant 0 : index
    %0 = vector.load %arg2[%c0, %c0_0] : memref<16x32xf32, #tpu.memory_space<vmem>>, vector<16x32xf32>
    %c0_1 = arith.constant 0 : index
    %c0_2 = arith.constant 0 : index
    %1 = vector.load %arg3[%c0_1, %c0_2] : memref<1x32xf32, #tpu.memory_space<vmem>>, vector<1x32xf32>
    %c0_3 = arith.constant 0 : index
    %c0_4 = arith.constant 0 : index
    %2 = vector.load %arg4[%c0_3, %c0_4] : memref<1x32xf32, #tpu.memory_space<vmem>>, vector<1x32xf32>
    %cst = arith.constant dense<0.000000e+00> : vector<16xf32>
    %3 = vector.multi_reduction <add>, %0, %cst [1] : vector<16x32xf32> to vector<16xf32>
    %4 = vector.shape_cast %3 : vector<16xf32> to vector<16x1xf32>
    %cst_5 = arith.constant 3.200000e+01 : f32
    %5 = vector.broadcast %cst_5 : f32 to vector<16x1xf32>
    %6 = arith.divf %4, %5 : vector<16x1xf32>
    %7 = vector.broadcast %6 : vector<16x1xf32> to vector<16x32xf32>
    %8 = arith.subf %0, %7 : vector<16x32xf32>
    %9 = arith.mulf %8, %8 : vector<16x32xf32>
    %cst_6 = arith.constant dense<0.000000e+00> : vector<16xf32>
    %10 = vector.multi_reduction <add>, %9, %cst_6 [1] : vector<16x32xf32> to vector<16xf32>
    %11 = vector.shape_cast %10 : vector<16xf32> to vector<16x1xf32>
    %cst_7 = arith.constant 3.200000e+01 : f32
    %12 = vector.broadcast %cst_7 : f32 to vector<16x1xf32>
    %13 = arith.divf %11, %12 : vector<16x1xf32>
    %14 = vector.broadcast %6 : vector<16x1xf32> to vector<16x32xf32>
    %15 = arith.subf %0, %14 : vector<16x32xf32>
    %cst_8 = arith.constant 9.99999974E-6 : f32
    %16 = vector.broadcast %cst_8 : f32 to vector<16x1xf32>
    %17 = arith.addf %13, %16 : vector<16x1xf32>
    %18 = math.rsqrt %17 : vector<16x1xf32>
    %19 = vector.broadcast %18 : vector<16x1xf32> to vector<16x32xf32>
    %20 = arith.mulf %15, %19 : vector<16x32xf32>
    %21 = vector.broadcast %1 : vector<1x32xf32> to vector<16x32xf32>
    %22 = arith.mulf %20, %21 : vector<16x32xf32>
    %23 = vector.broadcast %2 : vector<1x32xf32> to vector<16x32xf32>
    %24 = arith.addf %22, %23 : vector<16x32xf32>
    %25 = arith.truncf %24 : vector<16x32xf32> to vector<16x32xbf16>
    %c0_9 = arith.constant 0 : index
    %c0_10 = arith.constant 0 : index
    %26 = vector.load %arg5[%c0_9, %c0_10] : memref<32x96xbf16, #tpu.memory_space<vmem>>, vector<32x96xbf16>
    %cst_11 = arith.constant dense<0.000000e+00> : vector<16x96xf32>
    %27 = tpu.matmul %25, %26, %cst_11 {dimension_numbers = #tpu.dot_dimension_numbers<[1], [0], [0], [1], [0, 0, 1, 1], [], []>} : vector<16x32xbf16>, vector<32x96xbf16>, vector<16x96xf32> -> vector<16x96xf32>
    %c0_12 = arith.constant 0 : index
    %c0_13 = arith.constant 0 : index
    %28 = vector.load %arg6[%c0_12, %c0_13] : memref<1x96xf32, #tpu.memory_space<vmem>>, vector<1x96xf32>
    %29 = vector.broadcast %28 : vector<1x96xf32> to vector<16x96xf32>
    %30 = arith.addf %27, %29 : vector<16x96xf32>
    %c0_14 = arith.constant 0 : index
    %c0_15 = arith.constant 0 : index
    %31 = vector.load %arg7[%c0_14, %c0_15] : memref<16x96xf32, #tpu.memory_space<vmem>>, vector<16x96xf32>
    tpu.vector_store %arg7[%c0_14, %c0_15], %30 {strides = array<i32>} : memref<16x96xf32, #tpu.memory_space<vmem>>, vector<16x96xf32>,
    return
  }
  func.func @transform_0(%arg0: i32, %arg1: i32) -> (i32, i32) {
    %c0_i32 = arith.constant 0 : i32
    %c0_i32_0 = arith.constant 0 : i32
    return %arg0, %c0_i32 : i32, i32
  }
  func.func @transform_1(%arg0: i32, %arg1: i32) -> (i32, i32) {
    %c0_i32 = arith.constant 0 : i32
    %c0_i32_0 = arith.constant 0 : i32
    %c0_i32_1 = arith.constant 0 : i32
    return %c0_i32, %c0_i32_0 : i32, i32
  }
  func.func @transform_2(%arg0: i32, %arg1: i32) -> (i32, i32) {
    %c0_i32 = arith.constant 0 : i32
    %c0_i32_0 = arith.constant 0 : i32
    %c0_i32_1 = arith.constant 0 : i32
    return %c0_i32, %c0_i32_0 : i32, i32
  }
  func.func @transform_3(%arg0: i32, %arg1: i32) -> (i32, i32) {
    %c0_i32 = arith.constant 0 : i32
    %c0_i32_0 = arith.constant 0 : i32
    return %c0_i32, %arg1 : i32, i32
  }
  func.func @transform_4(%arg0: i32, %arg1: i32) -> (i32, i32) {
    %c0_i32 = arith.constant 0 : i32
    %c0_i32_0 = arith.constant 0 : i32
    return %c0_i32, %arg1 : i32, i32
  }
  func.func @transform_5(%arg0: i32, %arg1: i32) -> (i32, i32) {
    %c0_i32 = arith.constant 0 : i32
    return %arg0, %arg1 : i32, i32
  }
}

module attributes {stable_mosaic.version = 11 : i64} {
  func.func @flash_attn_kernel(%arg0: i32, %arg1: i32, %arg2: i32, %arg3: memref<1x8x8xf32, #tpu.memory_space<vmem>>, %arg4: memref<1x8x8xf32, #tpu.memory_space<vmem>>, %arg5: memref<1x8x8xf32, #tpu.memory_space<vmem>>, %arg6: memref<1x8x8xf32, #tpu.memory_space<vmem>>, %arg7: memref<8x1xf32, #tpu.memory_space<vmem>>, %arg8: memref<8x1xf32, #tpu.memory_space<vmem>>, %arg9: memref<8x8xf32, #tpu.memory_space<vmem>>) attributes {dimension_semantics = [#tpu.dimension_semantics<parallel>, #tpu.dimension_semantics<parallel>, #tpu.dimension_semantics<arbitrary>], iteration_bounds = array<i64: 8, 1, 1>, scalar_prefetch = 0 : i64, scratch_operands = 3 : i64, tpu.core_type = #tpu.core_type<tc>, window_params = [{transform_indices = @transform_0, window_bounds = array<i64: 1, 8, 8>}, {transform_indices = @transform_1, window_bounds = array<i64: 1, 8, 8>}, {transform_indices = @transform_2, window_bounds = array<i64: 1, 8, 8>}, {transform_indices = @transform_3, window_bounds = array<i64: 1, 8, 8>}]} {
    %c0_i32 = arith.constant 0 : i32
    %0 = arith.cmpi eq, %arg2, %c0_i32 : i32
    %1 = arith.extui %0 : i1 to i32
    %c0_i32_0 = arith.constant 0 : i32
    %2 = arith.cmpi ne, %1, %c0_i32_0 : i32
    scf.if %2 {
      %cst = arith.constant -1.000000e+30 : f32
      %9 = vector.broadcast %cst : f32 to vector<8x1xf32>
      %c0 = arith.constant 0 : index
      %c0_3 = arith.constant 0 : index
      %10 = vector.load %arg7[%c0, %c0_3] : memref<8x1xf32, #tpu.memory_space<vmem>>, vector<8x1xf32>
      tpu.vector_store %arg7[%c0, %c0_3], %9 {strides = array<i32>} : memref<8x1xf32, #tpu.memory_space<vmem>>, vector<8x1xf32>,
      %cst_4 = arith.constant 0.000000e+00 : f32
      %11 = vector.broadcast %cst_4 : f32 to vector<8x1xf32>
      %c0_5 = arith.constant 0 : index
      %c0_6 = arith.constant 0 : index
      %12 = vector.load %arg8[%c0_5, %c0_6] : memref<8x1xf32, #tpu.memory_space<vmem>>, vector<8x1xf32>
      tpu.vector_store %arg8[%c0_5, %c0_6], %11 {strides = array<i32>} : memref<8x1xf32, #tpu.memory_space<vmem>>, vector<8x1xf32>,
      %cst_7 = arith.constant 0.000000e+00 : f32
      %13 = vector.broadcast %cst_7 : f32 to vector<8x8xf32>
      %c0_8 = arith.constant 0 : index
      %c0_9 = arith.constant 0 : index
      %14 = vector.load %arg9[%c0_8, %c0_9] : memref<8x8xf32, #tpu.memory_space<vmem>>, vector<8x8xf32>
      tpu.vector_store %arg9[%c0_8, %c0_9], %13 {strides = array<i32>} : memref<8x8xf32, #tpu.memory_space<vmem>>, vector<8x8xf32>,
    } else {
    }
    %3 = arith.cmpi sle, %arg2, %arg1 : i32
    %4 = arith.extui %3 : i1 to i32
    %c0_i32_1 = arith.constant 0 : i32
    %5 = arith.cmpi ne, %4, %c0_i32_1 : i32
    scf.if %5 {
      %c0 = arith.constant 0 : index
      %c0_3 = arith.constant 0 : index
      %c0_4 = arith.constant 0 : index
      %9 = vector.load %arg3[%c0, %c0_3, %c0_4] : memref<1x8x8xf32, #tpu.memory_space<vmem>>, vector<1x8x8xf32>
      %10 = vector.shape_cast %9 : vector<1x8x8xf32> to vector<8x8xf32>
      %cst = arith.constant 0.353553385 : f32
      %11 = vector.broadcast %cst : f32 to vector<8x8xf32>
      %12 = arith.mulf %10, %11 : vector<8x8xf32>
      %13 = arith.truncf %12 : vector<8x8xf32> to vector<8x8xbf16>
      %c0_5 = arith.constant 0 : index
      %c0_6 = arith.constant 0 : index
      %c0_7 = arith.constant 0 : index
      %14 = vector.load %arg4[%c0_5, %c0_6, %c0_7] : memref<1x8x8xf32, #tpu.memory_space<vmem>>, vector<1x8x8xf32>
      %15 = vector.shape_cast %14 : vector<1x8x8xf32> to vector<8x8xf32>
      %16 = arith.truncf %15 : vector<8x8xf32> to vector<8x8xbf16>
      %cst_8 = arith.constant dense<0.000000e+00> : vector<8x8xf32>
      %17 = tpu.matmul %13, %16, %cst_8 {dimension_numbers = #tpu.dot_dimension_numbers<[1], [1], [0], [0], [0, 0, 1, 0], [], []>} : vector<8x8xbf16>, vector<8x8xbf16>, vector<8x8xf32> -> vector<8x8xf32>
      %c8_i32 = arith.constant 8 : i32
      %18 = arith.muli %arg1, %c8_i32 : i32
      %19 = tpu.iota {dimensions = array<i32: 0>} : vector<8x8xi32>
      %20 = vector.broadcast %18 : i32 to vector<8x8xi32>
      %21 = arith.addi %20, %19 : vector<8x8xi32>
      %c8_i32_9 = arith.constant 8 : i32
      %22 = arith.muli %arg2, %c8_i32_9 : i32
      %23 = tpu.iota {dimensions = array<i32: 1>} : vector<8x8xi32>
      %24 = vector.broadcast %22 : i32 to vector<8x8xi32>
      %25 = arith.addi %24, %23 : vector<8x8xi32>
      %26 = arith.cmpi sle, %25, %21 : vector<8x8xi32>
      %cst_10 = arith.constant -1.000000e+30 : f32
      %27 = vector.broadcast %cst_10 : f32 to vector<8x8xf32>
      %28 = arith.select %26, %17, %27 : vector<8x8xi1>, vector<8x8xf32>
      %c0_11 = arith.constant 0 : index
      %c0_12 = arith.constant 0 : index
      %29 = vector.load %arg7[%c0_11, %c0_12] : memref<8x1xf32, #tpu.memory_space<vmem>>, vector<8x1xf32>
      %cst_13 = arith.constant dense<0xFF800000> : vector<8xf32>
      %30 = vector.multi_reduction <maximumf>, %28, %cst_13 [1] : vector<8x8xf32> to vector<8xf32>
      %31 = vector.shape_cast %30 : vector<8xf32> to vector<8x1xf32>
      %32 = arith.maximumf %29, %31 : vector<8x1xf32>
      %33 = arith.subf %29, %32 : vector<8x1xf32>
      %34 = math.exp %33 : vector<8x1xf32>
      %35 = vector.broadcast %32 : vector<8x1xf32> to vector<8x8xf32>
      %36 = arith.subf %28, %35 : vector<8x8xf32>
      %37 = math.exp %36 : vector<8x8xf32>
      %c0_14 = arith.constant 0 : index
      %c0_15 = arith.constant 0 : index
      %38 = vector.load %arg8[%c0_14, %c0_15] : memref<8x1xf32, #tpu.memory_space<vmem>>, vector<8x1xf32>
      %39 = arith.mulf %34, %38 : vector<8x1xf32>
      %cst_16 = arith.constant dense<0.000000e+00> : vector<8xf32>
      %40 = vector.multi_reduction <add>, %37, %cst_16 [1] : vector<8x8xf32> to vector<8xf32>
      %41 = vector.shape_cast %40 : vector<8xf32> to vector<8x1xf32>
      %42 = arith.addf %39, %41 : vector<8x1xf32>
      %c0_17 = arith.constant 0 : index
      %c0_18 = arith.constant 0 : index
      %43 = vector.load %arg8[%c0_17, %c0_18] : memref<8x1xf32, #tpu.memory_space<vmem>>, vector<8x1xf32>
      tpu.vector_store %arg8[%c0_17, %c0_18], %42 {strides = array<i32>} : memref<8x1xf32, #tpu.memory_space<vmem>>, vector<8x1xf32>,
      %c0_19 = arith.constant 0 : index
      %c0_20 = arith.constant 0 : index
      %44 = vector.load %arg9[%c0_19, %c0_20] : memref<8x8xf32, #tpu.memory_space<vmem>>, vector<8x8xf32>
      %45 = vector.broadcast %34 : vector<8x1xf32> to vector<8x8xf32>
      %46 = arith.mulf %45, %44 : vector<8x8xf32>
      %47 = arith.truncf %37 : vector<8x8xf32> to vector<8x8xbf16>
      %c0_21 = arith.constant 0 : index
      %c0_22 = arith.constant 0 : index
      %c0_23 = arith.constant 0 : index
      %48 = vector.load %arg5[%c0_21, %c0_22, %c0_23] : memref<1x8x8xf32, #tpu.memory_space<vmem>>, vector<1x8x8xf32>
      %49 = vector.shape_cast %48 : vector<1x8x8xf32> to vector<8x8xf32>
      %50 = arith.truncf %49 : vector<8x8xf32> to vector<8x8xbf16>
      %cst_24 = arith.constant dense<0.000000e+00> : vector<8x8xf32>
      %51 = tpu.matmul %47, %50, %cst_24 {dimension_numbers = #tpu.dot_dimension_numbers<[1], [0], [0], [1], [0, 0, 1, 1], [], []>} : vector<8x8xbf16>, vector<8x8xbf16>, vector<8x8xf32> -> vector<8x8xf32>
      %52 = arith.addf %46, %51 : vector<8x8xf32>
      %c0_25 = arith.constant 0 : index
      %c0_26 = arith.constant 0 : index
      %53 = vector.load %arg9[%c0_25, %c0_26] : memref<8x8xf32, #tpu.memory_space<vmem>>, vector<8x8xf32>
      tpu.vector_store %arg9[%c0_25, %c0_26], %52 {strides = array<i32>} : memref<8x8xf32, #tpu.memory_space<vmem>>, vector<8x8xf32>,
      %c0_27 = arith.constant 0 : index
      %c0_28 = arith.constant 0 : index
      %54 = vector.load %arg7[%c0_27, %c0_28] : memref<8x1xf32, #tpu.memory_space<vmem>>, vector<8x1xf32>
      tpu.vector_store %arg7[%c0_27, %c0_28], %32 {strides = array<i32>} : memref<8x1xf32, #tpu.memory_space<vmem>>, vector<8x1xf32>,
    } else {
    }
    %6 = arith.cmpi eq, %arg2, %arg1 : i32
    %7 = arith.extui %6 : i1 to i32
    %c0_i32_2 = arith.constant 0 : i32
    %8 = arith.cmpi ne, %7, %c0_i32_2 : i32
    scf.if %8 {
      %c0 = arith.constant 0 : index
      %c0_3 = arith.constant 0 : index
      %9 = vector.load %arg8[%c0, %c0_3] : memref<8x1xf32, #tpu.memory_space<vmem>>, vector<8x1xf32>
      %10 = tpu.reciprocal %9 {approx = true} : vector<8x1xf32> -> vector<8x1xf32>
      %c0_4 = arith.constant 0 : index
      %c0_5 = arith.constant 0 : index
      %11 = vector.load %arg9[%c0_4, %c0_5] : memref<8x8xf32, #tpu.memory_space<vmem>>, vector<8x8xf32>
      %12 = vector.broadcast %10 : vector<8x1xf32> to vector<8x8xf32>
      %13 = arith.mulf %11, %12 : vector<8x8xf32>
      %c0_6 = arith.constant 0 : index
      %c0_7 = arith.constant 0 : index
      %c0_8 = arith.constant 0 : index
      %14 = vector.load %arg6[%c0_6, %c0_7, %c0_8] : memref<1x8x8xf32, #tpu.memory_space<vmem>>, vector<1x8x8xf32>
      %15 = vector.shape_cast %14 : vector<1x8x8xf32> to vector<8x8xf32>
      %16 = vector.shape_cast %13 : vector<8x8xf32> to vector<1x8x8xf32>
      tpu.vector_store %arg6[%c0_6, %c0_7, %c0_8], %16 {strides = array<i32>} : memref<1x8x8xf32, #tpu.memory_space<vmem>>, vector<1x8x8xf32>,
    } else {
    }
    return
  }
  func.func @transform_0(%arg0: i32, %arg1: i32, %arg2: i32) -> (i32, i32, i32) {
    %c0_i32 = arith.constant 0 : i32
    %c0_i32_0 = arith.constant 0 : i32
    return %arg0, %arg1, %c0_i32 : i32, i32, i32
  }
  func.func @transform_1(%arg0: i32, %arg1: i32, %arg2: i32) -> (i32, i32, i32) {
    %0 = arith.minsi %arg2, %arg1 : i32
    %c0_i32 = arith.constant 0 : i32
    %c0_i32_0 = arith.constant 0 : i32
    return %arg0, %0, %c0_i32 : i32, i32, i32
  }
  func.func @transform_2(%arg0: i32, %arg1: i32, %arg2: i32) -> (i32, i32, i32) {
    %0 = arith.minsi %arg2, %arg1 : i32
    %c0_i32 = arith.constant 0 : i32
    %c0_i32_0 = arith.constant 0 : i32
    return %arg0, %0, %c0_i32 : i32, i32, i32
  }
  func.func @transform_3(%arg0: i32, %arg1: i32, %arg2: i32) -> (i32, i32, i32) {
    %c0_i32 = arith.constant 0 : i32
    %c0_i32_0 = arith.constant 0 : i32
    return %arg0, %arg1, %c0_i32 : i32, i32, i32
  }
}

module attributes {stable_mosaic.version = 11 : i64} {
  func.func @residual_matmul_kernel(%arg0: i32, %arg1: i32, %arg2: i32, %arg3: memref<16x32xf32, #tpu.memory_space<vmem>>, %arg4: memref<16x32xf32, #tpu.memory_space<vmem>>, %arg5: memref<32x32xbf16, #tpu.memory_space<vmem>>, %arg6: memref<1x32xf32, #tpu.memory_space<vmem>>, %arg7: memref<16x32xf32, #tpu.memory_space<vmem>>) attributes {dimension_semantics = [#tpu.dimension_semantics<parallel>, #tpu.dimension_semantics<parallel>, #tpu.dimension_semantics<arbitrary>], iteration_bounds = array<i64: 1, 1, 1>, scalar_prefetch = 0 : i64, scratch_operands = 0 : i64, tpu.core_type = #tpu.core_type<tc>, window_params = [{transform_indices = @transform_0, window_bounds = array<i64: 16, 32>}, {transform_indices = @transform_1, window_bounds = array<i64: 16, 32>}, {transform_indices = @transform_2, window_bounds = array<i64: 32, 32>}, {transform_indices = @transform_3, window_bounds = array<i64: 1, 32>}, {transform_indices = @transform_4, window_bounds = array<i64: 16, 32>}]} {
    %c0_i32 = arith.constant 0 : i32
    %0 = arith.cmpi eq, %arg2, %c0_i32 : i32
    %1 = arith.extui %0 : i1 to i32
    %c0_i32_0 = arith.constant 0 : i32
    %2 = arith.cmpi ne, %1, %c0_i32_0 : i32
    scf.if %2 {
      %c0_8 = arith.constant 0 : index
      %c0_9 = arith.constant 0 : index
      %10 = vector.load %arg3[%c0_8, %c0_9] : memref<16x32xf32, #tpu.memory_space<vmem>>, vector<16x32xf32>
      %c0_10 = arith.constant 0 : index
      %c0_11 = arith.constant 0 : index
      %11 = vector.load %arg6[%c0_10, %c0_11] : memref<1x32xf32, #tpu.memory_space<vmem>>, vector<1x32xf32>
      %12 = vector.broadcast %11 : vector<1x32xf32> to vector<16x32xf32>
      %13 = arith.addf %10, %12 : vector<16x32xf32>
      %c0_12 = arith.constant 0 : index
      %c0_13 = arith.constant 0 : index
      %14 = vector.load %arg7[%c0_12, %c0_13] : memref<16x32xf32, #tpu.memory_space<vmem>>, vector<16x32xf32>
      tpu.vector_store %arg7[%c0_12, %c0_13], %13 {strides = array<i32>} : memref<16x32xf32, #tpu.memory_space<vmem>>, vector<16x32xf32>,
    } else {
    }
    %c0 = arith.constant 0 : index
    %c0_1 = arith.constant 0 : index
    %3 = vector.load %arg7[%c0, %c0_1] : memref<16x32xf32, #tpu.memory_space<vmem>>, vector<16x32xf32>
    %c0_2 = arith.constant 0 : index
    %c0_3 = arith.constant 0 : index
    %4 = vector.load %arg4[%c0_2, %c0_3] : memref<16x32xf32, #tpu.memory_space<vmem>>, vector<16x32xf32>
    %5 = arith.truncf %4 : vector<16x32xf32> to vector<16x32xbf16>
    %c0_4 = arith.constant 0 : index
    %c0_5 = arith.constant 0 : index
    %6 = vector.load %arg5[%c0_4, %c0_5] : memref<32x32xbf16, #tpu.memory_space<vmem>>, vector<32x32xbf16>
    %cst = arith.constant dense<0.000000e+00> : vector<16x32xf32>
    %7 = tpu.matmul %5, %6, %cst {dimension_numbers = #tpu.dot_dimension_numbers<[1], [0], [0], [1], [0, 0, 1, 1], [], []>} : vector<16x32xbf16>, vector<32x32xbf16>, vector<16x32xf32> -> vector<16x32xf32>
    %8 = arith.addf %3, %7 : vector<16x32xf32>
    %c0_6 = arith.constant 0 : index
    %c0_7 = arith.constant 0 : index
    %9 = vector.load %arg7[%c0_6, %c0_7] : memref<16x32xf32, #tpu.memory_space<vmem>>, vector<16x32xf32>
    tpu.vector_store %arg7[%c0_6, %c0_7], %8 {strides = array<i32>} : memref<16x32xf32, #tpu.memory_space<vmem>>, vector<16x32xf32>,
    return
  }
  func.func @transform_0(%arg0: i32, %arg1: i32, %arg2: i32) -> (i32, i32) {
    %c0_i32 = arith.constant 0 : i32
    return %arg0, %arg1 : i32, i32
  }
  func.func @transform_1(%arg0: i32, %arg1: i32, %arg2: i32) -> (i32, i32) {
    %c0_i32 = arith.constant 0 : i32
    return %arg0, %arg2 : i32, i32
  }
  func.func @transform_2(%arg0: i32, %arg1: i32, %arg2: i32) -> (i32, i32) {
    %c0_i32 = arith.constant 0 : i32
    return %arg2, %arg1 : i32, i32
  }
  func.func @transform_3(%arg0: i32, %arg1: i32, %arg2: i32) -> (i32, i32) {
    %c0_i32 = arith.constant 0 : i32
    %c0_i32_0 = arith.constant 0 : i32
    return %c0_i32, %arg1 : i32, i32
  }
  func.func @transform_4(%arg0: i32, %arg1: i32, %arg2: i32) -> (i32, i32) {
    %c0_i32 = arith.constant 0 : i32
    return %arg0, %arg1 : i32, i32
  }
}

module attributes {stable_mosaic.version = 11 : i64} {
  func.func @ln_matmul_kernel(%arg0: i32, %arg1: i32, %arg2: memref<16x32xf32, #tpu.memory_space<vmem>>, %arg3: memref<1x32xf32, #tpu.memory_space<vmem>>, %arg4: memref<1x32xf32, #tpu.memory_space<vmem>>, %arg5: memref<32x128xbf16, #tpu.memory_space<vmem>>, %arg6: memref<1x128xf32, #tpu.memory_space<vmem>>, %arg7: memref<16x128xf32, #tpu.memory_space<vmem>>) attributes {dimension_semantics = [#tpu.dimension_semantics<parallel>, #tpu.dimension_semantics<parallel>], iteration_bounds = array<i64: 1, 1>, scalar_prefetch = 0 : i64, scratch_operands = 0 : i64, tpu.core_type = #tpu.core_type<tc>, window_params = [{transform_indices = @transform_0, window_bounds = array<i64: 16, 32>}, {pipeline_mode = #tpu.pipeline_mode<synchronous>, transform_indices = @transform_1, window_bounds = array<i64: 1, 32>}, {pipeline_mode = #tpu.pipeline_mode<synchronous>, transform_indices = @transform_2, window_bounds = array<i64: 1, 32>}, {transform_indices = @transform_3, window_bounds = array<i64: 32, 128>}, {transform_indices = @transform_4, window_bounds = array<i64: 1, 128>}, {transform_indices = @transform_5, window_bounds = array<i64: 16, 128>}]} {
    %c0 = arith.constant 0 : index
    %c0_0 = arith.constant 0 : index
    %0 = vector.load %arg2[%c0, %c0_0] : memref<16x32xf32, #tpu.memory_space<vmem>>, vector<16x32xf32>
    %c0_1 = arith.constant 0 : index
    %c0_2 = arith.constant 0 : index
    %1 = vector.load %arg3[%c0_1, %c0_2] : memref<1x32xf32, #tpu.memory_space<vmem>>, vector<1x32xf32>
    %c0_3 = arith.constant 0 : index
    %c0_4 = arith.constant 0 : index
    %2 = vector.load %arg4[%c0_3, %c0_4] : memref<1x32xf32, #tpu.memory_space<vmem>>, vector<1x32xf32>
    %cst = arith.constant dense<0.000000e+00> : vector<16xf32>
    %3 = vector.multi_reduction <add>, %0, %cst [1] : vector<16x32xf32> to vector<16xf32>
    %4 = vector.shape_cast %3 : vector<16xf32> to vector<16x1xf32>
    %cst_5 = arith.constant 3.200000e+01 : f32
    %5 = vector.broadcast %cst_5 : f32 to vector<16x1xf32>
    %6 = arith.divf %4, %5 : vector<16x1xf32>
    %7 = vector.broadcast %6 : vector<16x1xf32> to vector<16x32xf32>
    %8 = arith.subf %0, %7 : vector<16x32xf32>
    %9 = arith.mulf %8, %8 : vector<16x32xf32>
    %cst_6 = arith.constant dense<0.000000e+00> : vector<16xf32>
    %10 = vector.multi_reduction <add>, %9, %cst_6 [1] : vector<16x32xf32> to vector<16xf32>
    %11 = vector.shape_cast %10 : vector<16xf32> to vector<16x1xf32>
    %cst_7 = arith.constant 3.200000e+01 : f32
    %12 = vector.broadcast %cst_7 : f32 to vector<16x1xf32>
    %13 = arith.divf %11, %12 : vector<16x1xf32>
    %14 = vector.broadcast %6 : vector<16x1xf32> to vector<16x32xf32>
    %15 = arith.subf %0, %14 : vector<16x32xf32>
    %cst_8 = arith.constant 9.99999974E-6 : f32
    %16 = vector.broadcast %cst_8 : f32 to vector<16x1xf32>
    %17 = arith.addf %13, %16 : vector<16x1xf32>
    %18 = math.rsqrt %17 : vector<16x1xf32>
    %19 = vector.broadcast %18 : vector<16x1xf32> to vector<16x32xf32>
    %20 = arith.mulf %15, %19 : vector<16x32xf32>
    %21 = vector.broadcast %1 : vector<1x32xf32> to vector<16x32xf32>
    %22 = arith.mulf %20, %21 : vector<16x32xf32>
    %23 = vector.broadcast %2 : vector<1x32xf32> to vector<16x32xf32>
    %24 = arith.addf %22, %23 : vector<16x32xf32>
    %25 = arith.truncf %24 : vector<16x32xf32> to vector<16x32xbf16>
    %c0_9 = arith.constant 0 : index
    %c0_10 = arith.constant 0 : index
    %26 = vector.load %arg5[%c0_9, %c0_10] : memref<32x128xbf16, #tpu.memory_space<vmem>>, vector<32x128xbf16>
    %cst_11 = arith.constant dense<0.000000e+00> : vector<16x128xf32>
    %27 = tpu.matmul %25, %26, %cst_11 {dimension_numbers = #tpu.dot_dimension_numbers<[1], [0], [0], [1], [0, 0, 1, 1], [], []>} : vector<16x32xbf16>, vector<32x128xbf16>, vector<16x128xf32> -> vector<16x128xf32>
    %c0_12 = arith.constant 0 : index
    %c0_13 = arith.constant 0 : index
    %28 = vector.load %arg6[%c0_12, %c0_13] : memref<1x128xf32, #tpu.memory_space<vmem>>, vector<1x128xf32>
    %29 = vector.broadcast %28 : vector<1x128xf32> to vector<16x128xf32>
    %30 = arith.addf %27, %29 : vector<16x128xf32>
    %cst_14 = arith.constant 5.000000e-01 : f32
    %31 = vector.broadcast %cst_14 : f32 to vector<16x128xf32>
    %32 = arith.mulf %31, %30 : vector<16x128xf32>
    %33 = arith.mulf %30, %30 : vector<16x128xf32>
    %34 = arith.mulf %30, %33 : vector<16x128xf32>
    %cst_15 = arith.constant 4.471500e-02 : f32
    %35 = vector.broadcast %cst_15 : f32 to vector<16x128xf32>
    %36 = arith.mulf %35, %34 : vector<16x128xf32>
    %37 = arith.addf %30, %36 : vector<16x128xf32>
    %cst_16 = arith.constant 0.797884583 : f32
    %38 = vector.broadcast %cst_16 : f32 to vector<16x128xf32>
    %39 = arith.mulf %38, %37 : vector<16x128xf32>
    %40 = math.tanh %39 : vector<16x128xf32>
    %cst_17 = arith.constant 1.000000e+00 : f32
    %41 = vector.broadcast %cst_17 : f32 to vector<16x128xf32>
    %42 = arith.addf %41, %40 : vector<16x128xf32>
    %43 = arith.mulf %32, %42 : vector<16x128xf32>
    %c0_18 = arith.constant 0 : index
    %c0_19 = arith.constant 0 : index
    %44 = vector.load %arg7[%c0_18, %c0_19] : memref<16x128xf32, #tpu.memory_space<vmem>>, vector<16x128xf32>
    tpu.vector_store %arg7[%c0_18, %c0_19], %43 {strides = array<i32>} : memref<16x128xf32, #tpu.memory_space<vmem>>, vector<16x128xf32>,
    return
  }
  func.func @transform_0(%arg0: i32, %arg1: i32) -> (i32, i32) {
    %c0_i32 = arith.constant 0 : i32
    %c0_i32_0 = arith.constant 0 : i32
    return %arg0, %c0_i32 : i32, i32
  }
  func.func @transform_1(%arg0: i32, %arg1: i32) -> (i32, i32) {
    %c0_i32 = arith.constant 0 : i32
    %c0_i32_0 = arith.constant 0 : i32
    %c0_i32_1 = arith.constant 0 : i32
    return %c0_i32, %c0_i32_0 : i32, i32
  }
  func.func @transform_2(%arg0: i32, %arg1: i32) -> (i32, i32) {
    %c0_i32 = arith.constant 0 : i32
    %c0_i32_0 = arith.constant 0 : i32
    %c0_i32_1 = arith.constant 0 : i32
    return %c0_i32, %c0_i32_0 : i32, i32
  }
  func.func @transform_3(%arg0: i32, %arg1: i32) -> (i32, i32) {
    %c0_i32 = arith.constant 0 : i32
    %c0_i32_0 = arith.constant 0 : i32
    return %c0_i32, %arg1 : i32, i32
  }
  func.func @transform_4(%arg0: i32, %arg1: i32) -> (i32, i32) {
    %c0_i32 = arith.constant 0 : i32
    %c0_i32_0 = arith.constant 0 : i32
    return %c0_i32, %arg1 : i32, i32
  }
  func.func @transform_5(%arg0: i32, %arg1: i32) -> (i32, i32) {
    %c0_i32 = arith.constant 0 : i32
    return %arg0, %arg1 : i32, i32
  }
}

module attributes {stable_mosaic.version = 11 : i64} {
  func.func @residual_matmul_kernel(%arg0: i32, %arg1: i32, %arg2: i32, %arg3: memref<16x32xf32, #tpu.memory_space<vmem>>, %arg4: memref<16x128xf32, #tpu.memory_space<vmem>>, %arg5: memref<128x32xbf16, #tpu.memory_space<vmem>>, %arg6: memref<1x32xf32, #tpu.memory_space<vmem>>, %arg7: memref<16x32xf32, #tpu.memory_space<vmem>>) attributes {dimension_semantics = [#tpu.dimension_semantics<parallel>, #tpu.dimension_semantics<parallel>, #tpu.dimension_semantics<arbitrary>], iteration_bounds = array<i64: 1, 1, 1>, scalar_prefetch = 0 : i64, scratch_operands = 0 : i64, tpu.core_type = #tpu.core_type<tc>, window_params = [{transform_indices = @transform_0, window_bounds = array<i64: 16, 32>}, {transform_indices = @transform_1, window_bounds = array<i64: 16, 128>}, {transform_indices = @transform_2, window_bounds = array<i64: 128, 32>}, {transform_indices = @transform_3, window_bounds = array<i64: 1, 32>}, {transform_indices = @transform_4, window_bounds = array<i64: 16, 32>}]} {
    %c0_i32 = arith.constant 0 : i32
    %0 = arith.cmpi eq, %arg2, %c0_i32 : i32
    %1 = arith.extui %0 : i1 to i32
    %c0_i32_0 = arith.constant 0 : i32
    %2 = arith.cmpi ne, %1, %c0_i32_0 : i32
    scf.if %2 {
      %c0_8 = arith.constant 0 : index
      %c0_9 = arith.constant 0 : index
      %10 = vector.load %arg3[%c0_8, %c0_9] : memref<16x32xf32, #tpu.memory_space<vmem>>, vector<16x32xf32>
      %c0_10 = arith.constant 0 : index
      %c0_11 = arith.constant 0 : index
      %11 = vector.load %arg6[%c0_10, %c0_11] : memref<1x32xf32, #tpu.memory_space<vmem>>, vector<1x32xf32>
      %12 = vector.broadcast %11 : vector<1x32xf32> to vector<16x32xf32>
      %13 = arith.addf %10, %12 : vector<16x32xf32>
      %c0_12 = arith.constant 0 : index
      %c0_13 = arith.constant 0 : index
      %14 = vector.load %arg7[%c0_12, %c0_13] : memref<16x32xf32, #tpu.memory_space<vmem>>, vector<16x32xf32>
      tpu.vector_store %arg7[%c0_12, %c0_13], %13 {strides = array<i32>} : memref<16x32xf32, #tpu.memory_space<vmem>>, vector<16x32xf32>,
    } else {
    }
    %c0 = arith.constant 0 : index
    %c0_1 = arith.constant 0 : index
    %3 = vector.load %arg7[%c0, %c0_1] : memref<16x32xf32, #tpu.memory_space<vmem>>, vector<16x32xf32>
    %c0_2 = arith.constant 0 : index
    %c0_3 = arith.constant 0 : index
    %4 = vector.load %arg4[%c0_2, %c0_3] : memref<16x128xf32, #tpu.memory_space<vmem>>, vector<16x128xf32>
    %5 = arith.truncf %4 : vector<16x128xf32> to vector<16x128xbf16>
    %c0_4 = arith.constant 0 : index
    %c0_5 = arith.constant 0 : index
    %6 = vector.load %arg5[%c0_4, %c0_5] : memref<128x32xbf16, #tpu.memory_space<vmem>>, vector<128x32xbf16>
    %cst = arith.constant dense<0.000000e+00> : vector<16x32xf32>
    %7 = tpu.matmul %5, %6, %cst {dimension_numbers = #tpu.dot_dimension_numbers<[1], [0], [0], [1], [0, 0, 1, 1], [], []>} : vector<16x128xbf16>, vector<128x32xbf16>, vector<16x32xf32> -> vector<16x32xf32>
    %8 = arith.addf %3, %7 : vector<16x32xf32>
    %c0_6 = arith.constant 0 : index
    %c0_7 = arith.constant 0 : index
    %9 = vector.load %arg7[%c0_6, %c0_7] : memref<16x32xf32, #tpu.memory_space<vmem>>, vector<16x32xf32>
    tpu.vector_store %arg7[%c0_6, %c0_7], %8 {strides = array<i32>} : memref<16x32xf32, #tpu.memory_space<vmem>>, vector<16x32xf32>,
    return
  }
  func.func @transform_0(%arg0: i32, %arg1: i32, %arg2: i32) -> (i32, i32) {
    %c0_i32 = arith.constant 0 : i32
    return %arg0, %arg1 : i32, i32
  }
  func.func @transform_1(%arg0: i32, %arg1: i32, %arg2: i32) -> (i32, i32) {
    %c0_i32 = arith.constant 0 : i32
    return %arg0, %arg2 : i32, i32
  }
  func.func @transform_2(%arg0: i32, %arg1: i32, %arg2: i32) -> (i32, i32) {
    %c0_i32 = arith.constant 0 : i32
    return %arg2, %arg1 : i32, i32
  }
  func.func @transform_3(%arg0: i32, %arg1: i32, %arg2: i32) -> (i32, i32) {
    %c0_i32 = arith.constant 0 : i32
    %c0_i32_0 = arith.constant 0 : i32
    return %c0_i32, %arg1 : i32, i32
  }
  func.func @transform_4(%arg0: i32, %arg1: i32, %arg2: i32) -> (i32, i32) {
    %c0_i32 = arith.constant 0 : i32
    return %arg0, %arg1 : i32, i32
  }
}

module attributes {stable_mosaic.version = 11 : i64} {
  func.func @lm_head_kernel(%arg0: i32, %arg1: i32, %arg2: memref<16x32xf32, #tpu.memory_space<vmem>>, %arg3: memref<1x32xf32, #tpu.memory_space<vmem>>, %arg4: memref<1x32xf32, #tpu.memory_space<vmem>>, %arg5: memref<128x32xbf16, #tpu.memory_space<vmem>>, %arg6: memref<16x128xf32, #tpu.memory_space<vmem>>) attributes {dimension_semantics = [#tpu.dimension_semantics<parallel>, #tpu.dimension_semantics<parallel>], iteration_bounds = array<i64: 1, 1>, scalar_prefetch = 0 : i64, scratch_operands = 0 : i64, tpu.core_type = #tpu.core_type<tc>, window_params = [{transform_indices = @transform_0, window_bounds = array<i64: 16, 32>}, {pipeline_mode = #tpu.pipeline_mode<synchronous>, transform_indices = @transform_1, window_bounds = array<i64: 1, 32>}, {pipeline_mode = #tpu.pipeline_mode<synchronous>, transform_indices = @transform_2, window_bounds = array<i64: 1, 32>}, {transform_indices = @transform_3, window_bounds = array<i64: 128, 32>}, {transform_indices = @transform_4, window_bounds = array<i64: 16, 128>}]} {
    %c0 = arith.constant 0 : index
    %c0_0 = arith.constant 0 : index
    %0 = vector.load %arg2[%c0, %c0_0] : memref<16x32xf32, #tpu.memory_space<vmem>>, vector<16x32xf32>
    %c0_1 = arith.constant 0 : index
    %c0_2 = arith.constant 0 : index
    %1 = vector.load %arg3[%c0_1, %c0_2] : memref<1x32xf32, #tpu.memory_space<vmem>>, vector<1x32xf32>
    %c0_3 = arith.constant 0 : index
    %c0_4 = arith.constant 0 : index
    %2 = vector.load %arg4[%c0_3, %c0_4] : memref<1x32xf32, #tpu.memory_space<vmem>>, vector<1x32xf32>
    %cst = arith.constant dense<0.000000e+00> : vector<16xf32>
    %3 = vector.multi_reduction <add>, %0, %cst [1] : vector<16x32xf32> to vector<16xf32>
    %4 = vector.shape_cast %3 : vector<16xf32> to vector<16x1xf32>
    %cst_5 = arith.constant 3.200000e+01 : f32
    %5 = vector.broadcast %cst_5 : f32 to vector<16x1xf32>
    %6 = arith.divf %4, %5 : vector<16x1xf32>
    %7 = vector.broadcast %6 : vector<16x1xf32> to vector<16x32xf32>
    %8 = arith.subf %0, %7 : vector<16x32xf32>
    %9 = arith.mulf %8, %8 : vector<16x32xf32>
    %cst_6 = arith.constant dense<0.000000e+00> : vector<16xf32>
    %10 = vector.multi_reduction <add>, %9, %cst_6 [1] : vector<16x32xf32> to vector<16xf32>
    %11 = vector.shape_cast %10 : vector<16xf32> to vector<16x1xf32>
    %cst_7 = arith.constant 3.200000e+01 : f32
    %12 = vector.broadcast %cst_7 : f32 to vector<16x1xf32>
    %13 = arith.divf %11, %12 : vector<16x1xf32>
    %14 = vector.broadcast %6 : vector<16x1xf32> to vector<16x32xf32>
    %15 = arith.subf %0, %14 : vector<16x32xf32>
    %cst_8 = arith.constant 9.99999974E-6 : f32
    %16 = vector.broadcast %cst_8 : f32 to vector<16x1xf32>
    %17 = arith.addf %13, %16 : vector<16x1xf32>
    %18 = math.rsqrt %17 : vector<16x1xf32>
    %19 = vector.broadcast %18 : vector<16x1xf32> to vector<16x32xf32>
    %20 = arith.mulf %15, %19 : vector<16x32xf32>
    %21 = vector.broadcast %1 : vector<1x32xf32> to vector<16x32xf32>
    %22 = arith.mulf %20, %21 : vector<16x32xf32>
    %23 = vector.broadcast %2 : vector<1x32xf32> to vector<16x32xf32>
    %24 = arith.addf %22, %23 : vector<16x32xf32>
    %25 = arith.truncf %24 : vector<16x32xf32> to vector<16x32xbf16>
    %c0_9 = arith.constant 0 : index
    %c0_10 = arith.constant 0 : index
    %26 = vector.load %arg5[%c0_9, %c0_10] : memref<128x32xbf16, #tpu.memory_space<vmem>>, vector<128x32xbf16>
    %cst_11 = arith.constant dense<0.000000e+00> : vector<16x128xf32>
    %27 = tpu.matmul %25, %26, %cst_11 {dimension_numbers = #tpu.dot_dimension_numbers<[1], [1], [0], [0], [0, 0, 1, 0], [], []>} : vector<16x32xbf16>, vector<128x32xbf16>, vector<16x128xf32> -> vector<16x128xf32>
    %c0_12 = arith.constant 0 : index
    %c0_13 = arith.constant 0 : index
    %28 = vector.load %arg6[%c0_12, %c0_13] : memref<16x128xf32, #tpu.memory_space<vmem>>, vector<16x128xf32>
    tpu.vector_store %arg6[%c0_12, %c0_13], %27 {strides = array<i32>} : memref<16x128xf32, #tpu.memory_space<vmem>>, vector<16x128xf32>,
    return
  }
  func.func @transform_0(%arg0: i32, %arg1: i32) -> (i32, i32) {
    %c0_i32 = arith.constant 0 : i32
    %c0_i32_0 = arith.constant 0 : i32
    return %arg0, %c0_i32 : i32, i32
  }
  func.func @transform_1(%arg0: i32, %arg1: i32) -> (i32, i32) {
    %c0_i32 = arith.constant 0 : i32
    %c0_i32_0 = arith.constant 0 : i32
    %c0_i32_1 = arith.constant 0 : i32
    return %c0_i32, %c0_i32_0 : i32, i32
  }
  func.func @transform_2(%arg0: i32, %arg1: i32) -> (i32, i32) {
    %c0_i32 = arith.constant 0 : i32
    %c0_i32_0 = arith.constant 0 : i32
    %c0_i32_1 = arith.constant 0 : i32
    return %c0_i32, %c0_i32_0 : i32, i32
  }
  func.func @transform_3(%arg0: i32, %arg1: i32) -> (i32, i32) {
    %c0_i32 = arith.constant 0 : i32
    %c0_i32_0 = arith.constant 0 : i32
    return %arg1, %c0_i32 : i32, i32
  }
  func.func @transform_4(%arg0: i32, %arg1: i32) -> (i32, i32) {
    %c0_i32 = arith.constant 0 : i32
    return %arg0, %arg1 : i32, i32
  }
}

</mosaic_0001>

<bundles_post_ra>
// kernel: gpt2_forward.11
= control target key start
LH: loop header
LB: loop body
LE: loop exit
PB: predicated region body
PF: predicated region fallthrough
CT: control target
= control target key end

     0   :  { %vm25_vm0 = vcmask 261120   ;;  %v169_v15 = vmov 0.0   ;;  %vm170_vm1 = vmmov 0   ;;  %vm137_vm2 = vcmask 785408   ;;  %s233_s0 = inlined_call_operand.vmem [shape: f32[16,32], index: 0, kind: input, shape index: {}]   ;;  %s234_s3 = inlined_call_operand.vmem [shape: bf16[32,96], index: 3, kind: input, shape index: {}]   ;;  %s235_s1 = inlined_call_operand.vmem [shape: f32[1,32], index: 1, kind: input, shape index: {}]   ;;  %s236_s2 = inlined_call_operand.vmem [shape: f32[1,32], index: 2, kind: input, shape index: {}]   ;;  %s237_s4 = inlined_call_operand.vmem [shape: f32[1,96], index: 4, kind: input, shape index: {}]   ;;  %s238_s5 = inlined_call_operand.vmem [shape: f32[16,96], index: 5, kind: output, shape index: {}]  }
   0x1   :  { %v21_v0 = vld [vmem:[%s233_s0] sm:$0xff]  ;;  %v22_v1 = vld [vmem:[%s233_s0 + $0x8] sm:$0xff]  ;;  %153 = vmatprep.subr.bf16.mxu0 %v169_v15  ;;  %157 = vmatprep.mubr.msk.bf16.mxu0 %vm170_vm1, %v169_v15 }
   0x2   :  { %v26_v2 = vsel %vm25_vm0, %v21_v0, 0.0  ;;  %v29_v3 = vsel %vm25_vm0, %v22_v1, 0.0  ;;  %v163_v14 = vld [vmem:[%s234_s3] sm:$0xff]   ;;  %v164_v16 = vld [vmem:[%s234_s3 + $0x8] sm:$0xff]  }
   0x3   :  { %27 = vadd.xlane.f32.xlu0 %v26_v2  ;;  %154 = vmatpush3.bf16.msra.mxu0 %v163_v14  ;;  %v144_v25 = vld [vmem:[%s235_s1] ss:$0 sm:$0xff] }
   0x4   :  { %155 = vmatprep.subr.bf16.mxu0 %v169_v15  ;;  %v145_v29 = vld [vmem:[%s236_s2] ss:$0 sm:$0xff] }
   0x5   :  { %v146_v34 = vld [vmem:[%s237_s4] ss:$0 sm:$0xff] }
   0x7   :  { %30 = vadd.xlane.f32.xlu0 %v29_v3  ;;  %156 = vmatpush3.bf16.msra.mxu0 %v164_v16 }
  0x90   :  { %v28_v4 = vpop.xlane.xlu0 %27 }
  0x91   :  { %v33_v5 = vmul.f32 0.03125, %v28_v4 }
  0x93   :  { %v35_v6 = vsub.f32 %v21_v0, %v33_v5 }
  0x94   :  { %v31_v7 = vpop.xlane.xlu0 %30 }
  0x95   :  { %v34_v8 = vmul.f32 0.03125, %v31_v7  ;;  %v37_v9 = vmul.f32 %v35_v6, %v35_v6 }
  0x97   :  { %v36_v10 = vsub.f32 %v22_v1, %v34_v8  ;;  %v39_v11 = vsel %vm25_vm0, %v37_v9, 0.0 }
  0x98   :  { %40 = vadd.xlane.f32.xlu1 %v39_v11 }
  0x99   :  { %v38_v12 = vmul.f32 %v36_v10, %v36_v10 }
  0x9b   :  { %v42_v13 = vsel %vm25_vm0, %v38_v12, 0.0 }
  0x9c   :  { %43 = vadd.xlane.f32.xlu1 %v42_v13 }
 0x125   :  { %v41_v17 = vpop.xlane.xlu1 %40 }
 0x126   :  { %v45_v18 = vmul.f32 0.03125, %v41_v17 }
 0x128   :  { %v47_v19 = vadd.f32 1e-05, %v45_v18 }
 0x129   :  { %v44_v20 = vpop.xlane.xlu1 %43 }
 0x12a   :  { %165 = vrsqrt.f32 %v47_v19  ;;  %v46_v21 = vmul.f32 0.03125, %v44_v20 }
 0x12c   :  { %v48_v22 = vadd.f32 1e-05, %v46_v21 }
 0x12e   :  { %167 = vrsqrt.f32 %v48_v22 }
 0x134   :  { %v166_v23 = vpop.eup %165 }
 0x135   :  { %v51_v24 = vmul.f32 %v166_v23, %v35_v6 }
 0x137   :  { %v59_v28 = vmul.f32 %v144_v25, %v51_v24 }
 0x138   :  { %v168_v26 = vpop.eup %167 }
 0x139   :  { %v52_v27 = vmul.f32 %v168_v26, %v36_v10  ;;  %v67_v31 = vadd.f32 %v145_v29, %v59_v28 }
 0x13b   :  { %v60_v30 = vmul.f32 %v144_v25, %v52_v27 }
 0x13d   :  { %v68_v32 = vadd.f32 %v145_v29, %v60_v30 }
 0x13f   :  { %v69_v33 = vpack.c.bf16 %v68_v32, %v67_v31 }
 0x141   :  { %158 = vmatmul.mubr.msk.bf16.vlgmr.msra.gmra.mrb[0].mxu0 %vm25_vm0, %v69_v33 }
 0x214   :  { %v130_v35 = vpop.f32.mrb[0].mxu0 }
 0x215   :  { %v131_v36 = vadd.f32 %v146_v34, %v130_v35  ;;  %v159_v37 = vpop.f32.mrb[1].mxu0 }
 0x216   :  { %v133_v38 = vpop.f32.mrb[2].mxu0 }
 0x217   :  { %138 = vst.msk [vmem:[%s238_s5] sm:$0xff] %vm137_vm2, %v131_v36  ;;  %v134_v39 = vadd.f32 %v146_v34, %v133_v38  ;;  %v160_v40 = vpop.f32.mrb[3].mxu0 }
 0x219   :  { %139 = vst.msk [vmem:[%s238_s5 + $0x8] sm:$0xff] %vm137_vm2, %v134_v39 }

// kernel: gpt2_forward.13
= control target key start
LH: loop header
LB: loop body
LE: loop exit
PB: predicated region body
PF: predicated region fallthrough
CT: control target
= control target key end

     0   :  { %v129_v0 = vmov 0.0   ;;  %vm130_vm0 = vmmov 0   ;;  %vm33_vm1 = vcmask 261120   ;;  %s200_s2 = inlined_call_operand.vmem [shape: bf16[32,32], index: 2, kind: input, shape index: {}]   ;;  %s201_s1 = inlined_call_operand.vmem [shape: f32[16,32], index: 1, kind: input, shape index: {}]   ;;  %s202_s0 = inlined_call_operand.vmem [shape: f32[16,32], index: 0, kind: input, shape index: {}, may-alias: {0,4}]   ;;  %s203_s3 = inlined_call_operand.vmem [shape: f32[1,32], index: 3, kind: input, shape index: {}]   ;;  %s204_s4 = inlined_call_operand.vmem [shape: f32[16,32], index: 4, kind: output, shape index: {}, may-alias: {0,4}]  }
   0x1   :  { %117 = vmatprep.subr.bf16.mxu0 %v129_v0  ;;  %v127_v1 = vld [vmem:[%s200_s2] sm:$0xff]   ;;  %121 = vmatprep.mubr.msk.bf16.mxu0 %vm130_vm0, %v129_v0  ;;  %v128_v2 = vld [vmem:[%s200_s2 + $0x8] sm:$0xff]  }
   0x2   :  { %118 = vmatpush3.bf16.msra.mxu0 %v127_v1  ;;  %v38_v3 = vld [vmem:[%s201_s1] sm:$0xff]  ;;  %v39_v4 = vld [vmem:[%s201_s1 + $0x8] sm:$0xff] }
   0x3   :  { %v22_v5 = vld [vmem:[%s202_s0] sm:$0xff]  ;;  %119 = vmatprep.subr.bf16.mxu0 %v129_v0  ;;  %v40_v8 = vpack.c.bf16 %v39_v4, %v38_v3 }
   0x4   :  { %v110_v6 = vld [vmem:[%s203_s3] ss:$0 sm:$0xff] }
   0x5   :  { %v31_v7 = vadd.f32 %v110_v6, %v22_v5 }
   0x6   :  { %120 = vmatpush3.bf16.msra.mxu0 %v128_v2 }
   0x7   :  { %34 = vst.msk [vmem:[%s204_s4] sm:$0xff] %vm33_vm1, %v31_v7 }
   0x9   :  { %122 = vmatmul.mubr.msk.bf16.vlgmr.msra.gmra.mrb[0].mxu0 %vm33_vm1, %v40_v8 }
   0xe   :  { %v23_v9 = vld [vmem:[%s202_s0 + $0x8] sm:$0xff]  ;;  %v36_v11 = vld [vmem:[%s204_s4] sm:$0xff] }
   0xf   :  { %v32_v10 = vadd.f32 %v110_v6, %v23_v9 }
  0x11   :  { %35 = vst.msk [vmem:[%s204_s4 + $0x8] sm:$0xff] %vm33_vm1, %v32_v10 }
  0x18   :  { %v37_v13 = vld [vmem:[%s204_s4 + $0x8] sm:$0xff] }
  0xdc   :  { %v95_v12 = vpop.f32.mrb[0].mxu0 }
  0xdd   :  { %v102_v14 = vadd.f32 %v95_v12, %v36_v11  ;;  %v123_v15 = vpop.f32.mrb[1].mxu0 }
  0xde   :  { %v98_v16 = vpop.f32.mrb[2].mxu0 }
  0xdf   :  { %104 = vst.msk [vmem:[%s204_s4] sm:$0xff] %vm33_vm1, %v102_v14  ;;  %v103_v17 = vadd.f32 %v98_v16, %v37_v13  ;;  %v124_v18 = vpop.f32.mrb[3].mxu0 }
  0xe1   :  { %105 = vst.msk [vmem:[%s204_s4 + $0x8] sm:$0xff] %vm33_vm1, %v103_v17 }

// kernel: gpt2_forward.12
= control target key start
LH: loop header
LB: loop body
LE: loop exit
PB: predicated region body
PF: predicated region fallthrough
CT: control target
= control target key end

     0   :  { %s685_s12 = smov 0   ;;  %s687_s13 = smov 0   ;;  %s742_s0 = inlined_call_operand.vmem [shape: f32[8,8,8], index: 0, kind: input, shape index: {}]   ;;  %s743_s1 = inlined_call_operand.vmem [shape: f32[8,8,8], index: 1, kind: input, shape index: {}]   ;;  %s744_s2 = inlined_call_operand.vmem [shape: f32[8,8,8], index: 2, kind: input, shape index: {}]   ;;  %s745_s3 = inlined_call_operand.vmem [shape: f32[8,8,8], index: 3, kind: output, shape index: {}]  }
   0x1   :  { %s689_s14 = smov 0  }
   0x2 LB: > { %s32_s15 = sadd.s32 1, %s655_s13  ;;  %p576_p0 = scmp.ge.s32.totalorder %s659_s14, 1  ;;  %s659_s14 = sphi %s689_s14, %s13_s14   ;;  %s655_s13 = sphi %s687_s13, %s747_s13   ;;  %s651_s12 = sphi %s685_s12, %s746_s12  }
   0x3   : > { %p34_p1 = scmp.ge.s32.totalorder %s32_s15, 8  ;;  %p206_p2 = scmp.lt.s32.totalorder %s659_s14, 9 }
   0x5   : > { %s749_s15 = smov (%p34_p1, %s32_s15), 0  ;;  %p207_p3 = pnand %p576_p0, %p206_p2 }
   0x6   : > { %p252_p4 = scmp.lt.s32.totalorder (!%p207_p3), %s651_s12, 7  ;;  %vm296_vm0 = vcmask (!%p207_p3), 64512   ;;  %v661_v0 = vmov (!%p207_p3), 0.0   ;;  %vm662_vm1 = vmmov (!%p207_p3), 0   ;;  %vm293_vm2 = vcmask (!%p207_p3), 7168  }
   0x7   : > { %210 = sbr.rel (%p207_p3) target bundleno = 824 (0x338), region = 32  ;;  %589 = vmatprep.subr.bf16.mxu0 (!%p207_p3), %v661_v0  ;;  %297 = vst.msk [vmem:[#allocation4] sm:$0xff] (!%p207_p3), %vm296_vm0, %v661_v0  ;;  %591 = vmatprep.mubr.msk.bf16.mxu0 (!%p207_p3), %vm662_vm1, %v661_v0  ;;  %v663_v7 = vmov (!%p207_p3), -1e+30   ;;  %v355_v8 = vlaneseq (!%p207_p3)  ;;  %v664_v17 = vmov (!%p207_p3), 0   ;;  %vm403_vm4 = vcmask (!%p207_p3), 1043456  }
   0x8   : > { %595 = vmatprep.subr.bf16.mxu1 (!%p207_p3), %v661_v0  ;;  %597 = vmatprep.mubr.msk.bf16.mxu1 (!%p207_p3), %vm662_vm1, %v661_v0  ;;  %294 = vst.msk [vmem:[#allocation2] sm:$0xff] (!%p207_p3), %vm293_vm2, %v663_v7  ;;  %295 = vst.msk [vmem:[#allocation3] sm:$0xff] (!%p207_p3), %vm293_vm2, %v661_v0 }
   0x9   : > { %v356_v9 = vshrl.u32 (!%p207_p3), %v355_v8, 7  ;;  %v361_v10 = vand.u32 (!%p207_p3), 127, %v355_v8  ;;  %629 = vset.pattern.permute.xlu0 (!%p207_p3), %v664_v17  ;;  %630 = vset.pattern.permute.xlu1 (!%p207_p3), %v664_v17 }
   0xb   : > { %vm364_vm3 = vcmp.le.s32.totalorder (!%p207_p3), %v361_v10, %v356_v9 }
   0xe   : > { %s751_s12 = smov (!%p252_p4, %s651_s12), 7  ;;  %v390_v39 = vld [vmem:[#allocation4] sm:$0xff] }
   0xf   : > { %s704_s16 = sshll.u32 %s751_s12, 3  ;;  %v366_v18 = vld [vmem:[#allocation2] sm:$0xff]  ;;  %v382_v33 = vld [vmem:[#allocation3] sm:$0xff] }
  0x10   : > { %s267_s19 = scalar_lea.vmem %s743_s1, %s704_s16  ;;  %s258_s22 = scalar_lea.vmem %s742_s0, %s704_s16 }
  0x11   : > { %v305_v1 = vld [vmem:[%s267_s19] sm:$0xff]  ;;  %s278_s25 = scalar_lea.vmem %s744_s2, %s704_s16  ;;  %s287_s28 = scalar_lea.vmem %s745_s3, %s704_s16 }
  0x12   : > { %v302_v2 = vld [vmem:[%s258_s22] sm:$0xff]  ;;  %v306_v3 = vpack.c.bf16 %v305_v1, %v305_v1 }
  0x13   : > { %v303_v5 = vmul.f32 0.35355338, %v302_v2  ;;  %v398_v22 = vld [vmem:[%s278_s25] sm:$0xff] }
  0x14   : > { %v312_v4 = vsel %vm296_vm0, %v306_v3, 0  ;;  %v399_v23 = vpack.c.bf16 %v398_v22, %v398_v22 }
  0x15   : > { %590 = vmatpush3.bf16.xpose.msra.mxu0 %v312_v4  ;;  %v304_v6 = vpack.c.bf16 %v303_v5, %v303_v5 }
  0x16   : > { %v405_v24 = vsel %vm403_vm4, %v399_v23, 0 }
  0x17   : > { %596 = vmatpush3.bf16.msra.mxu1 %v405_v24 }
  0x1c   : > { %592 = vmatmul.mubr.msk.bf16.vlgmr.msra.gmra.mrb[0].mxu0 %vm296_vm0, %v304_v6 }
  0xef   : > { %v348_v11 = vpop.f32.mrb[0].mxu0 }
  0xf0   : > { %v365_v12 = vsel %vm364_vm3, %v348_v11, -1e+30  ;;  %v593_v13 = vpop.f32.mrb[1].mxu0 }
  0xf1   : > { %v351_v14 = vpop.f32.mrb[2].mxu0  ;;  %v367_v15 = vsel %vm296_vm0, %v365_v12, -inf }
  0xf2   : > { %368 = vmax.xlane.f32.xlu0 %v367_v15  ;;  %v594_v16 = vpop.f32.mrb[3].mxu0 }
 0x17f   : > { %v369_v19 = vpop.xlane.xlu0 %368 }
 0x180   : > { %v370_v20 = vmax.f32 %v366_v18, %v369_v19 }
 0x182   : > { %v371_v21 = vsub.f32 %v366_v18, %v370_v20  ;;  %449 = vst.msk [vmem:[#allocation2] sm:$0xff] %vm293_vm2, %v370_v20  ;;  %376 = vperm.xlu0 %629, %v370_v20  }
 0x184   : > { %v372_v31 = vmul.f32 1.442695, %v371_v21 }
 0x201   : > { %v377_v25 = vpop.permute.xlu0 %376 }
 0x202   : > { %v379_v26 = vsub.f32 %v365_v12, %v377_v25 }
 0x204   : > { %v380_v27 = vmul.f32 1.442695, %v379_v26 }
 0x206   : > { %631 = vpow2.f32 %v380_v27 }
 0x207   : > { %633 = vpow2.f32 %v372_v31 }
 0x210   : > { %v632_v28 = vpop.eup %631 }
 0x211   : > { %v384_v29 = vsel %vm296_vm0, %v632_v28, 0.0  ;;  %v397_v30 = vpack.c.bf16 %v632_v28, %v632_v28  ;;  %v634_v32 = vpop.eup %633 }
 0x212   : > { %385 = vadd.xlane.f32.xlu1 %v384_v29  ;;  %v383_v34 = vmul.f32 %v634_v32, %v382_v33 }
 0x213   : > { %598 = vmatmul.mubr.msk.bf16.vlgmr.msra.gmra.mrb[0].mxu1 %vm296_vm0, %v397_v30 }
 0x223   : > { %393 = vperm.xlu1 %630, %v634_v32  }
 0x29f   : > { %v386_v35 = vpop.xlane.xlu1 %385 }
 0x2a0   : > { %v387_v36 = vadd.f32 %v386_v35, %v383_v34 }
 0x2a2   : > { %389 = vst.msk [vmem:[#allocation3] sm:$0xff] %vm293_vm2, %v387_v36 }
 0x2a3   : > { %v394_v40 = vpop.permute.xlu1 %393 }
 0x2a4   : > { %v396_v41 = vmul.f32 %v394_v40, %v390_v39 }
 0x2a9   : > { %v454_v37 = vld [vmem:[#allocation3] sm:$0xff] }
 0x2aa   : > { %635 = vrcp.f32 %v454_v37 }
 0x2b4   : > { %v636_v38 = vpop.eup %635 }
 0x2b5   : > { %459 = vperm.xlu1 %630, %v636_v38  }
 0x2e6   : > { %v441_v42 = vpop.f32.mrb[0].mxu1 }
 0x2e7   : > { %v447_v43 = vadd.f32 %v441_v42, %v396_v41  ;;  %v599_v44 = vpop.f32.mrb[1].mxu1 }
 0x2e8   : > { %v444_v45 = vpop.f32.mrb[2].mxu1 }
 0x2e9   : > { %448 = vst.msk [vmem:[#allocation4] sm:$0xff] %vm296_vm0, %v447_v43  ;;  %v600_v46 = vpop.f32.mrb[3].mxu1 }
 0x2f0   : > { %v456_v47 = vld [vmem:[#allocation4] sm:$0xff] }
 0x334   : > { %v460_v48 = vpop.permute.xlu1 %459 }
 0x335   : > { %v462_v49 = vmul.f32 %v460_v48, %v456_v47 }
 0x337   : > { %464 = vst.msk [vmem:[%s287_s28] sm:$0xff] %vm296_vm0, %v462_v49 }
 0x338 PF: > { %s13_s14 = sadd.s32 1, %s659_s14   ;;  %s746_s12 = smov %s655_s13 }
 0x339   : > { %p10_p5 = scmp.ge.s32.totalorder %s13_s14, 10   ;;  %s747_s13 = smov %s749_s15 }
 0x33b   :  { %12 = sbr.rel (!%p10_p5) target bundleno = 2 (0x2), region = 80 }

// kernel: gpt2_forward.14
= control target key start
LH: loop header
LB: loop body
LE: loop exit
PB: predicated region body
PF: predicated region fallthrough
CT: control target
= control target key end

     0   :  { %vm25_vm0 = vcmask 261120   ;;  %v190_v15 = vmov 0.0   ;;  %vm191_vm1 = vmmov 0   ;;  %s254_s0 = inlined_call_operand.vmem [shape: f32[16,32], index: 0, kind: input, shape index: {}]   ;;  %s255_s3 = inlined_call_operand.vmem [shape: bf16[32,128], index: 3, kind: input, shape index: {}]   ;;  %s256_s1 = inlined_call_operand.vmem [shape: f32[1,32], index: 1, kind: input, shape index: {}]   ;;  %s257_s2 = inlined_call_operand.vmem [shape: f32[1,32], index: 2, kind: input, shape index: {}]   ;;  %s258_s4 = inlined_call_operand.vmem [shape: f32[1,128], index: 4, kind: input, shape index: {}]   ;;  %s259_s5 = inlined_call_operand.vmem [shape: f32[16,128], index: 5, kind: output, shape index: {}]  }
   0x1   :  { %v21_v0 = vld [vmem:[%s254_s0] sm:$0xff]  ;;  %v22_v1 = vld [vmem:[%s254_s0 + $0x8] sm:$0xff]  ;;  %170 = vmatprep.subr.bf16.mxu0 %v190_v15  ;;  %174 = vmatprep.mubr.msk.bf16.mxu0 %vm191_vm1, %v190_v15 }
   0x2   :  { %v26_v2 = vsel %vm25_vm0, %v21_v0, 0.0  ;;  %v29_v3 = vsel %vm25_vm0, %v22_v1, 0.0  ;;  %v180_v14 = vld [vmem:[%s255_s3] sm:$0xff]   ;;  %v181_v16 = vld [vmem:[%s255_s3 + $0x8] sm:$0xff]  }
   0x3   :  { %27 = vadd.xlane.f32.xlu0 %v26_v2  ;;  %171 = vmatpush3.bf16.msra.mxu0 %v180_v14  ;;  %v161_v25 = vld [vmem:[%s256_s1] ss:$0 sm:$0xff] }
   0x4   :  { %172 = vmatprep.subr.bf16.mxu0 %v190_v15  ;;  %v162_v29 = vld [vmem:[%s257_s2] ss:$0 sm:$0xff] }
   0x5   :  { %v163_v34 = vld [vmem:[%s258_s4] ss:$0 sm:$0xff] }
   0x7   :  { %30 = vadd.xlane.f32.xlu0 %v29_v3  ;;  %173 = vmatpush3.bf16.msra.mxu0 %v181_v16 }
  0x90   :  { %v28_v4 = vpop.xlane.xlu0 %27 }
  0x91   :  { %v33_v5 = vmul.f32 0.03125, %v28_v4 }
  0x93   :  { %v35_v6 = vsub.f32 %v21_v0, %v33_v5 }
  0x94   :  { %v31_v7 = vpop.xlane.xlu0 %30 }
  0x95   :  { %v34_v8 = vmul.f32 0.03125, %v31_v7  ;;  %v37_v9 = vmul.f32 %v35_v6, %v35_v6 }
  0x97   :  { %v36_v10 = vsub.f32 %v22_v1, %v34_v8  ;;  %v39_v11 = vsel %vm25_vm0, %v37_v9, 0.0 }
  0x98   :  { %40 = vadd.xlane.f32.xlu1 %v39_v11 }
  0x99   :  { %v38_v12 = vmul.f32 %v36_v10, %v36_v10 }
  0x9b   :  { %v42_v13 = vsel %vm25_vm0, %v38_v12, 0.0 }
  0x9c   :  { %43 = vadd.xlane.f32.xlu1 %v42_v13 }
 0x125   :  { %v41_v17 = vpop.xlane.xlu1 %40 }
 0x126   :  { %v45_v18 = vmul.f32 0.03125, %v41_v17 }
 0x128   :  { %v47_v19 = vadd.f32 1e-05, %v45_v18 }
 0x129   :  { %v44_v20 = vpop.xlane.xlu1 %43 }
 0x12a   :  { %182 = vrsqrt.f32 %v47_v19  ;;  %v46_v21 = vmul.f32 0.03125, %v44_v20 }
 0x12c   :  { %v48_v22 = vadd.f32 1e-05, %v46_v21 }
 0x12e   :  { %184 = vrsqrt.f32 %v48_v22 }
 0x134   :  { %v183_v23 = vpop.eup %182 }
 0x135   :  { %v51_v24 = vmul.f32 %v183_v23, %v35_v6 }
 0x137   :  { %v59_v28 = vmul.f32 %v161_v25, %v51_v24 }
 0x138   :  { %v185_v26 = vpop.eup %184 }
 0x139   :  { %v52_v27 = vmul.f32 %v185_v26, %v36_v10  ;;  %v67_v31 = vadd.f32 %v162_v29, %v59_v28 }
 0x13b   :  { %v60_v30 = vmul.f32 %v161_v25, %v52_v27 }
 0x13d   :  { %v68_v32 = vadd.f32 %v162_v29, %v60_v30 }
 0x13f   :  { %v69_v33 = vpack.c.bf16 %v68_v32, %v67_v31 }
 0x141   :  { %175 = vmatmul.mubr.msk.bf16.vlgmr.msra.gmra.mrb[0].mxu0 %vm25_vm0, %v69_v33 }
 0x214   :  { %v130_v35 = vpop.f32.mrb[0].mxu0 }
 0x215   :  { %v131_v36 = vadd.f32 %v163_v34, %v130_v35  ;;  %v176_v37 = vpop.f32.mrb[1].mxu0 }
 0x216   :  { %v133_v38 = vpop.f32.mrb[2].mxu0 }
 0x217   :  { %v139_v39 = vmul.f32 %v131_v36, %v131_v36  ;;  %v134_v40 = vadd.f32 %v163_v34, %v133_v38  ;;  %v177_v41 = vpop.f32.mrb[3].mxu0  ;;  %v137_v52 = vmul.f32 0.5, %v131_v36 }
 0x219   :  { %v141_v42 = vmul.f32 %v139_v39, %v131_v36  ;;  %v140_v43 = vmul.f32 %v134_v40, %v134_v40  ;;  %v138_v56 = vmul.f32 0.5, %v134_v40 }
 0x21b   :  { %v143_v44 = vmul.f32 0.044715, %v141_v42  ;;  %v142_v45 = vmul.f32 %v140_v43, %v134_v40 }
 0x21d   :  { %v145_v46 = vadd.f32 %v143_v44, %v131_v36  ;;  %v144_v47 = vmul.f32 0.044715, %v142_v45 }
 0x21f   :  { %v147_v48 = vmul.f32 0.7978846, %v145_v46  ;;  %v146_v49 = vadd.f32 %v144_v47, %v134_v40 }
 0x221   :  { %186 = vtanh.f32 %v147_v48  ;;  %v148_v50 = vmul.f32 0.7978846, %v146_v49 }
 0x223   :  { %188 = vtanh.f32 %v148_v50 }
 0x22b   :  { %v187_v51 = vpop.eup %186 }
 0x22c   :  { %v151_v53 = vadd.f32 1.0, %v187_v51 }
 0x22d   :  { %v189_v54 = vpop.eup %188 }
 0x22e   :  { %v153_v55 = vmul.f32 %v151_v53, %v137_v52  ;;  %v152_v57 = vadd.f32 1.0, %v189_v54 }
 0x230   :  { %155 = vst [vmem:[%s259_s5] sm:$0xff] %v153_v55  ;;  %v154_v58 = vmul.f32 %v152_v57, %v138_v56 }
 0x232   :  { %156 = vst [vmem:[%s259_s5 + $0x8] sm:$0xff] %v154_v58 }

// kernel: gpt2_forward.15
= control target key start
LH: loop header
LB: loop body
LE: loop exit
PB: predicated region body
PF: predicated region fallthrough
CT: control target
= control target key end

     0   :  { %v203_v0 = vmov 0.0   ;;  %vm204_vm0 = vmmov 0   ;;  %vm33_vm1 = vcmask 261120   ;;  %s291_s2 = inlined_call_operand.vmem [shape: bf16[128,32], index: 2, kind: input, shape index: {}]   ;;  %s292_s0 = inlined_call_operand.vmem [shape: f32[16,32], index: 0, kind: input, shape index: {}, may-alias: {0,4}]   ;;  %s293_s3 = inlined_call_operand.vmem [shape: f32[1,32], index: 3, kind: input, shape index: {}]   ;;  %s294_s4 = inlined_call_operand.vmem [shape: f32[16,32], index: 4, kind: output, shape index: {}, may-alias: {0,4}]   ;;  %s295_s1 = inlined_call_operand.vmem [shape: f32[16,128], index: 1, kind: input, shape index: {}]  }
   0x1   :  { %173 = vmatprep.subr.bf16.mxu0 %v203_v0  ;;  %v195_v1 = vld [vmem:[%s291_s2] sm:$0xff]   ;;  %189 = vmatprep.mubr.msk.bf16.mxu0 %vm204_vm0, %v203_v0  ;;  %v196_v2 = vld [vmem:[%s291_s2 + $0x8] sm:$0xff]   ;;  %v197_v3 = vld [vmem:[%s291_s2 + $0x10] sm:$0xff]  }
   0x2   :  { %174 = vmatpush3.bf16.msra.mxu0 %v195_v1  ;;  %v22_v4 = vld [vmem:[%s292_s0] sm:$0xff]  ;;  %v198_v6 = vld [vmem:[%s291_s2 + $0x18] sm:$0xff]   ;;  %v200_v9 = vld [vmem:[%s291_s2 + $0x28] sm:$0xff]  }
   0x3   :  { %175 = vmatprep.subr.bf16.mxu0 %v203_v0  ;;  %v155_v5 = vld [vmem:[%s293_s3] ss:$0 sm:$0xff]  ;;  %v201_v10 = vld [vmem:[%s291_s2 + $0x30] sm:$0xff]   ;;  %v202_v11 = vld [vmem:[%s291_s2 + $0x38] sm:$0xff]  }
   0x4   :  { %v31_v7 = vadd.f32 %v155_v5, %v22_v4  ;;  %v199_v8 = vld [vmem:[%s291_s2 + $0x20] sm:$0xff]   ;;  %v39_v13 = vld [vmem:[%s295_s1 + $0x8] sm:$0xff] }
   0x5   :  { %v38_v12 = vld [vmem:[%s295_s1] sm:$0xff] }
   0x6   :  { %176 = vmatpush3.bf16.msra.mxu0 %v196_v2  ;;  %34 = vst.msk [vmem:[%s294_s4] sm:$0xff] %vm33_vm1, %v31_v7  ;;  %v40_v14 = vpack.c.bf16 %v39_v13, %v38_v12 }
   0x7   :  { %177 = vmatprep.subr.bf16.mxu0 %v203_v0 }
   0xa   :  { %178 = vmatpush3.bf16.msra.mxu0 %v197_v3 }
   0xb   :  { %179 = vmatprep.subr.bf16.mxu0 %v203_v0 }
   0xd   :  { %v23_v15 = vld [vmem:[%s292_s0 + $0x8] sm:$0xff]  ;;  %v36_v17 = vld [vmem:[%s294_s4] sm:$0xff] }
   0xe   :  { %180 = vmatpush3.bf16.msra.mxu0 %v198_v6  ;;  %v32_v16 = vadd.f32 %v155_v5, %v23_v15 }
   0xf   :  { %181 = vmatprep.subr.bf16.mxu0 %v203_v0 }
  0x10   :  { %35 = vst.msk [vmem:[%s294_s4 + $0x8] sm:$0xff] %vm33_vm1, %v32_v16 }
  0x12   :  { %182 = vmatpush3.bf16.msra.mxu0 %v199_v8 }
  0x13   :  { %183 = vmatprep.subr.bf16.mxu0 %v203_v0 }
  0x16   :  { %184 = vmatpush3.bf16.msra.mxu0 %v200_v9 }
  0x17   :  { %185 = vmatprep.subr.bf16.mxu0 %v203_v0  ;;  %v37_v19 = vld [vmem:[%s294_s4 + $0x8] sm:$0xff] }
  0x1a   :  { %186 = vmatpush3.bf16.msra.mxu0 %v201_v10 }
  0x1b   :  { %187 = vmatprep.subr.bf16.mxu0 %v203_v0 }
  0x1e   :  { %188 = vmatpush3.bf16.msra.mxu0 %v202_v11 }
  0x21   :  { %190 = vmatmul.mubr.bf16.vlgmr.msra.gmra.mrb[0].mxu0 %v40_v14 }
  0xf4   :  { %v139_v18 = vpop.f32.mrb[0].mxu0 }
  0xf5   :  { %v146_v20 = vadd.f32 %v139_v18, %v36_v17  ;;  %v191_v21 = vpop.f32.mrb[1].mxu0 }
  0xf6   :  { %v142_v22 = vpop.f32.mrb[2].mxu0 }
  0xf7   :  { %149 = vst.msk [vmem:[%s294_s4] sm:$0xff] %vm33_vm1, %v146_v20  ;;  %v147_v23 = vadd.f32 %v142_v22, %v37_v19  ;;  %v192_v24 = vpop.f32.mrb[3].mxu0 }
  0xf9   :  { %150 = vst.msk [vmem:[%s294_s4 + $0x8] sm:$0xff] %vm33_vm1, %v147_v23 }

// kernel: gpt2_forward.21
= control target key start
LH: loop header
LB: loop body
LE: loop exit
PB: predicated region body
PF: predicated region fallthrough
CT: control target
= control target key end

     0   :  { %vm22_vm0 = vcmask 261120   ;;  %v251_v4 = vmov 0.0   ;;  %vm252_vm1 = vmmov 0   ;;  %s333_s0 = inlined_call_operand.vmem [shape: f32[16,32], index: 0, kind: input, shape index: {}]   ;;  %s334_s3 = inlined_call_operand.vmem [shape: bf16[128,32], index: 3, kind: input, shape index: {}]   ;;  %s335_s1 = inlined_call_operand.vmem [shape: f32[1,32], index: 1, kind: input, shape index: {}]   ;;  %s336_s2 = inlined_call_operand.vmem [shape: f32[1,32], index: 2, kind: input, shape index: {}]   ;;  %s337_s4 = inlined_call_operand.vmem [shape: f32[16,128], index: 4, kind: output, shape index: {}]  }
   0x1   :  { %v18_v0 = vld [vmem:[%s333_s0] sm:$0xff]  ;;  %v19_v1 = vld [vmem:[%s333_s0 + $0x8] sm:$0xff]  ;;  %217 = vmatprep.subr.bf16.mxu0 %v251_v4  ;;  %v241_v9 = vld [vmem:[%s334_s3 + $0x10] sm:$0xff]   ;;  %233 = vmatprep.mubr.msk.bf16.mxu0 %vm252_vm1, %v251_v4 }
   0x2   :  { %v23_v2 = vsel %vm22_vm0, %v18_v0, 0.0  ;;  %v26_v3 = vsel %vm22_vm0, %v19_v1, 0.0  ;;  %v239_v5 = vld [vmem:[%s334_s3] sm:$0xff]   ;;  %v240_v7 = vld [vmem:[%s334_s3 + $0x8] sm:$0xff]   ;;  %v133_v10 = vsel %vm22_vm0, %v241_v9, 0  ;;  %v242_v11 = vld [vmem:[%s334_s3 + $0x18] sm:$0xff]  }
   0x3   :  { %24 = vadd.xlane.f32.xlu0 %v23_v2  ;;  %v127_v6 = vsel %vm22_vm0, %v239_v5, 0  ;;  %v130_v8 = vsel %vm22_vm0, %v240_v7, 0  ;;  %v136_v12 = vsel %vm22_vm0, %v242_v11, 0  ;;  %v243_v13 = vld [vmem:[%s334_s3 + $0x20] sm:$0xff]   ;;  %v244_v25 = vld [vmem:[%s334_s3 + $0x28] sm:$0xff]   ;;  %v245_v27 = vld [vmem:[%s334_s3 + $0x30] sm:$0xff]  }
   0x4   :  { %218 = vmatpush3.bf16.xpose.msra.mxu0 %v127_v6  ;;  %v139_v14 = vsel %vm22_vm0, %v243_v13, 0  ;;  %v142_v26 = vsel %vm22_vm0, %v244_v25, 0  ;;  %v145_v28 = vsel %vm22_vm0, %v245_v27, 0  ;;  %v246_v29 = vld [vmem:[%s334_s3 + $0x38] sm:$0xff]   ;;  %v197_v39 = vld [vmem:[%s335_s1] ss:$0 sm:$0xff] }
   0x5   :  { %219 = vmatprep.subr.bf16.mxu0 %v251_v4  ;;  %v148_v30 = vsel %vm22_vm0, %v246_v29, 0  ;;  %v198_v43 = vld [vmem:[%s336_s2] ss:$0 sm:$0xff] }
   0x7   :  { %27 = vadd.xlane.f32.xlu0 %v26_v3 }
   0xc   :  { %220 = vmatpush3.bf16.xpose.msra.mxu0 %v130_v8 }
   0xd   :  { %221 = vmatprep.subr.bf16.mxu0 %v251_v4 }
  0x14   :  { %222 = vmatpush3.bf16.xpose.msra.mxu0 %v133_v10 }
  0x15   :  { %223 = vmatprep.subr.bf16.mxu0 %v251_v4 }
  0x1c   :  { %224 = vmatpush3.bf16.xpose.msra.mxu0 %v136_v12 }
  0x1d   :  { %225 = vmatprep.subr.bf16.mxu0 %v251_v4 }
  0x24   :  { %226 = vmatpush3.bf16.xpose.msra.mxu0 %v139_v14 }
  0x25   :  { %227 = vmatprep.subr.bf16.mxu0 %v251_v4 }
  0x2c   :  { %228 = vmatpush3.bf16.xpose.msra.mxu0 %v142_v26 }
  0x2d   :  { %229 = vmatprep.subr.bf16.mxu0 %v251_v4 }
  0x34   :  { %230 = vmatpush3.bf16.xpose.msra.mxu0 %v145_v28 }
  0x35   :  { %231 = vmatprep.subr.bf16.mxu0 %v251_v4 }
  0x3c   :  { %232 = vmatpush3.bf16.xpose.msra.mxu0 %v148_v30 }
  0x90   :  { %v25_v15 = vpop.xlane.xlu0 %24 }
  0x91   :  { %v30_v16 = vmul.f32 0.03125, %v25_v15 }
  0x93   :  { %v32_v17 = vsub.f32 %v18_v0, %v30_v16 }
  0x94   :  { %v28_v18 = vpop.xlane.xlu0 %27 }
  0x95   :  { %v31_v19 = vmul.f32 0.03125, %v28_v18  ;;  %v34_v20 = vmul.f32 %v32_v17, %v32_v17 }
  0x97   :  { %v33_v21 = vsub.f32 %v19_v1, %v31_v19  ;;  %v36_v22 = vsel %vm22_vm0, %v34_v20, 0.0 }
  0x98   :  { %37 = vadd.xlane.f32.xlu1 %v36_v22 }
  0x99   :  { %v35_v23 = vmul.f32 %v33_v21, %v33_v21 }
  0x9b   :  { %v39_v24 = vsel %vm22_vm0, %v35_v23, 0.0 }
  0x9c   :  { %40 = vadd.xlane.f32.xlu1 %v39_v24 }
 0x125   :  { %v38_v31 = vpop.xlane.xlu1 %37 }
 0x126   :  { %v42_v32 = vmul.f32 0.03125, %v38_v31 }
 0x128   :  { %v44_v33 = vadd.f32 1e-05, %v42_v32 }
 0x129   :  { %v41_v34 = vpop.xlane.xlu1 %40 }
 0x12a   :  { %247 = vrsqrt.f32 %v44_v33  ;;  %v43_v35 = vmul.f32 0.03125, %v41_v34 }
 0x12c   :  { %v45_v36 = vadd.f32 1e-05, %v43_v35 }
 0x12e   :  { %249 = vrsqrt.f32 %v45_v36 }
 0x134   :  { %v248_v37 = vpop.eup %247 }
 0x135   :  { %v48_v38 = vmul.f32 %v248_v37, %v32_v17 }
 0x137   :  { %v56_v42 = vmul.f32 %v197_v39, %v48_v38 }
 0x138   :  { %v250_v40 = vpop.eup %249 }
 0x139   :  { %v49_v41 = vmul.f32 %v250_v40, %v33_v21  ;;  %v64_v45 = vadd.f32 %v198_v43, %v56_v42 }
 0x13b   :  { %v57_v44 = vmul.f32 %v197_v39, %v49_v41 }
 0x13d   :  { %v65_v46 = vadd.f32 %v198_v43, %v57_v44 }
 0x13f   :  { %v66_v47 = vpack.c.bf16 %v65_v46, %v64_v45 }
 0x141   :  { %234 = vmatmul.mubr.msk.bf16.vlgmr.msra.gmra.mrb[0].mxu0 %vm22_vm0, %v66_v47 }
 0x214   :  { %v184_v48 = vpop.f32.mrb[0].mxu0 }
 0x215   :  { %191 = vst [vmem:[%s337_s4] sm:$0xff] %v184_v48  ;;  %v235_v49 = vpop.f32.mrb[1].mxu0 }
 0x216   :  { %v187_v50 = vpop.f32.mrb[2].mxu0 }
 0x217   :  { %192 = vst [vmem:[%s337_s4 + $0x8] sm:$0xff] %v187_v50  ;;  %v236_v51 = vpop.f32.mrb[3].mxu0 }

</bundles_post_ra>
